<compile_context>
chip_gen: v6e
topology: v6e:2x2x1
jax: 0.10.0
libtpu: 0.0.40
codegen_flags: <defaults>
</compile_context>

<pallas_src>
import jax
import jax.numpy as jnp
from jax import lax
from jax.experimental import pallas as pl
from jax.experimental.pallas import tpu as pltpu


def _round_up(x, m):
    return (x + m - 1) // m * m


def attention_kernel(x_ref, wbd_ref, sexp_ref, rred_ref, o_ref):
    # x_ref   : [TB, N*C] VMEM, lane-dense stacked inputs
    # wbd_ref : [N*C, N]  block-diagonal Linear(C,1) weight
    # sexp_ref: [N, N*C]  0/1 expander  (attn[b,n] -> all C lanes of group n)
    # rred_ref: [N*C, C]  0/1 reducer   (sum over the N groups per channel)
    # o_ref   : [TB, C]
    x = x_ref[...].astype(jnp.float32)                              # [TB, N*C]

    # scores[b, n] = sum_c x[b, n*C + c] * w[c]      (MXU; bias dropped —
    # softmax over N is invariant to a constant added to every score)
    scores = jnp.dot(x, wbd_ref[...],
                     preferred_element_type=jnp.float32,
                     precision=lax.Precision.HIGHEST)               # [TB, N]

    # Numerically-stable softmax over the stack axis N (PyTorch dim=1),
    # exact division (no approx reciprocal).
    m = jnp.max(scores, axis=1, keepdims=True)                      # [TB, 1]
    e = jnp.exp(scores - m)                                         # [TB, N]
    attn = e / jnp.sum(e, axis=1, keepdims=True)                    # [TB, N]

    # Broadcast attn[b, n] across the C lanes of its group (MXU), one
    # lane-dense VPU multiply, then reduce over the N groups (MXU).
    attn_x = jnp.dot(attn, sexp_ref[...],
                     preferred_element_type=jnp.float32,
                     precision=lax.Precision.HIGHEST)               # [TB, N*C]
    weighted = x * attn_x                                           # [TB, N*C]
    out = jnp.dot(weighted, rred_ref[...],
                  preferred_element_type=jnp.float32,
                  precision=lax.Precision.HIGHEST)                  # [TB, C]
    o_ref[...] = out.astype(o_ref.dtype)


def attention_forward(stacked, weight, bias=None, *, tile_b=4096,
                      vmem_limit_bytes=None):
    """stacked: [B, N, C], weight: [1, C] (nn.Linear(C,1).weight), bias ignored
    (softmax-invariant).  Returns [B, C] float32."""
    del bias  # softmax over the stack axis cancels a constant per-score bias
    B, N, C = stacked.shape
    NC = N * C

    # Lane-dense view: free metadata reshape of the contiguous stack.
    x2d = stacked.reshape(B, NC)

    # Batch grid.  No input padding: the last input block may be ragged
    # (Pallas clips the DMA; unspecified tail rows produce garbage only in
    # padded output rows, which are sliced off below).  Guarantee >= 2 grid
    # steps for B >= 16 so v7x megacore can shard the "parallel" axis.
    nb = pl.cdiv(B, tile_b)
    if nb == 1 and B >= 16:
        nb = 2
    tb = _round_up(pl.cdiv(B, nb), 8)
    b_pad = nb * tb            # output allocation only — input is NOT copied

    w = weight.reshape(C).astype(jnp.float32)
    eye_n = jnp.eye(N, dtype=jnp.float32)
    # w_bd[n*C + c, m] = w[c] * (n == m)
    w_bd = (eye_n[:, None, :] * w[None, :, None]).reshape(NC, N)
    # s_exp[m, n*C + c] = (m == n)
    s_exp = jnp.repeat(eye_n, C, axis=1)                            # [N, N*C]
    # r_red[n*C + c, c'] = (c == c')
    r_red = jnp.tile(jnp.eye(C, dtype=jnp.float32), (N, 1))         # [N*C, C]

    cp = dict(dimension_semantics=("parallel",))
    if vmem_limit_bytes is not None:        # only needed for tile_b > ~4096
        cp["vmem_limit_bytes"] = vmem_limit_bytes

    out = pl.pallas_call(
        attention_kernel,
        out_shape=jax.ShapeDtypeStruct((b_pad, C), jnp.float32),
        grid=(nb,),
        in_specs=[
            pl.BlockSpec((tb, NC), lambda i: (i, 0)),    # lane-dense stream
            pl.BlockSpec((NC, N), lambda i: (0, 0)),     # resident constants
            pl.BlockSpec((N, NC), lambda i: (0, 0)),
            pl.BlockSpec((NC, C), lambda i: (0, 0)),
        ],
        out_specs=pl.BlockSpec((tb, C), lambda i: (i, 0)),
        compiler_params=pltpu.CompilerParams(**cp),
    )(x2d, w_bd, s_exp, r_red)
    return out[:B]


def attention_reference(stacked, weight, bias):
    scores = jnp.einsum("bnc,c->bn", stacked, weight[0],
                        precision=lax.Precision.HIGHEST) + bias[0]
    attn = jax.nn.softmax(scores, axis=1)
    return jnp.einsum("bn,bnc->bc", attn, stacked,
                      precision=lax.Precision.HIGHEST)


if __name__ == "__main__":
    B, N, C = 2, 8, 32  # batch, number of stacked inputs, in_channels

    key = jax.random.PRNGKey(0)
    k_inputs, k_w, k_b = jax.random.split(key, 3)

    # The PyTorch module receives a *list* of N tensors of shape [B, C].
    inputs = [
        jax.random.normal(k, (B, C), dtype=jnp.float32)
        for k in jax.random.split(k_inputs, N)
    ]
    stacked = jnp.stack(inputs, axis=1)  # [B, N, C]  (== torch.stack(inputs, dim=1))

    # Deterministic Linear(C, 1) params (PyTorch-default-style uniform init).
    bound = 1.0 / jnp.sqrt(jnp.float32(C))
    weight = jax.random.uniform(k_w, (1, C), jnp.float32, -bound, bound)  # [1, C]
    bias = jax.random.uniform(k_b, (1,), jnp.float32, -bound, bound)

    out = attention_forward(stacked, weight, bias)
    out = jax.block_until_ready(out)

    ref = attention_reference(stacked, weight, bias)  # reference keeps the bias
    assert out.shape == (B, C)
    # Exact softmax division + HIGHEST-precision matmuls -> f32-tight result.
    assert jnp.allclose(out, ref, atol=1e-4, rtol=1e-4), "mismatch vs reference"

    print("KERNEL_OK")
</pallas_src>

<mosaic_0001>
module attributes {stable_mosaic.version = 11 : i64} {
  func.func @attention_kernel(%arg0: i32, %arg1: memref<8x256xf32, #tpu.memory_space<vmem>>, %arg2: memref<256x8xf32, #tpu.memory_space<vmem>>, %arg3: memref<8x256xf32, #tpu.memory_space<vmem>>, %arg4: memref<256x32xf32, #tpu.memory_space<vmem>>, %arg5: memref<8x32xf32, #tpu.memory_space<vmem>>) attributes {dimension_semantics = [#tpu.dimension_semantics<parallel>], iteration_bounds = array<i64: 1>, scalar_prefetch = 0 : i64, scratch_operands = 0 : i64, tpu.core_type = #tpu.core_type<tc>, window_params = [{transform_indices = @transform_0, window_bounds = array<i64: 8, 256>}, {pipeline_mode = #tpu.pipeline_mode<synchronous>, transform_indices = @transform_1, window_bounds = array<i64: 256, 8>}, {pipeline_mode = #tpu.pipeline_mode<synchronous>, transform_indices = @transform_2, window_bounds = array<i64: 8, 256>}, {pipeline_mode = #tpu.pipeline_mode<synchronous>, transform_indices = @transform_3, window_bounds = array<i64: 256, 32>}, {transform_indices = @transform_4, window_bounds = array<i64: 8, 32>}]} {
    %c0 = arith.constant 0 : index
    %c0_0 = arith.constant 0 : index
    %0 = vector.load %arg1[%c0, %c0_0] : memref<8x256xf32, #tpu.memory_space<vmem>>, vector<8x256xf32>
    %c0_1 = arith.constant 0 : index
    %c0_2 = arith.constant 0 : index
    %1 = vector.load %arg2[%c0_1, %c0_2] : memref<256x8xf32, #tpu.memory_space<vmem>>, vector<256x8xf32>
    %cst = arith.constant dense<0.000000e+00> : vector<8x8xf32>
    %2 = tpu.matmul %0, %1, %cst {dimension_numbers = #tpu.dot_dimension_numbers<[1], [0], [0], [1], [0, 0, 1, 1], [], []>, precision = #tpu.contract_precision<fp32>} : vector<8x256xf32>, vector<256x8xf32>, vector<8x8xf32> -> vector<8x8xf32>
    %cst_3 = arith.constant dense<0xFF800000> : vector<8xf32>
    %3 = vector.multi_reduction <maximumf>, %2, %cst_3 [1] : vector<8x8xf32> to vector<8xf32>
    %4 = vector.shape_cast %3 : vector<8xf32> to vector<8x1xf32>
    %5 = vector.broadcast %4 : vector<8x1xf32> to vector<8x8xf32>
    %6 = arith.subf %2, %5 : vector<8x8xf32>
    %7 = math.exp %6 : vector<8x8xf32>
    %cst_4 = arith.constant dense<0.000000e+00> : vector<8xf32>
    %8 = vector.multi_reduction <add>, %7, %cst_4 [1] : vector<8x8xf32> to vector<8xf32>
    %9 = vector.shape_cast %8 : vector<8xf32> to vector<8x1xf32>
    %10 = vector.broadcast %9 : vector<8x1xf32> to vector<8x8xf32>
    %11 = arith.divf %7, %10 : vector<8x8xf32>
    %c0_5 = arith.constant 0 : index
    %c0_6 = arith.constant 0 : index
    %12 = vector.load %arg3[%c0_5, %c0_6] : memref<8x256xf32, #tpu.memory_space<vmem>>, vector<8x256xf32>
    %cst_7 = arith.constant dense<0.000000e+00> : vector<8x256xf32>
    %13 = tpu.matmul %11, %12, %cst_7 {dimension_numbers = #tpu.dot_dimension_numbers<[1], [0], [0], [1], [0, 0, 1, 1], [], []>, precision = #tpu.contract_precision<fp32>} : vector<8x8xf32>, vector<8x256xf32>, vector<8x256xf32> -> vector<8x256xf32>
    %14 = arith.mulf %0, %13 : vector<8x256xf32>
    %c0_8 = arith.constant 0 : index
    %c0_9 = arith.constant 0 : index
    %15 = vector.load %arg4[%c0_8, %c0_9] : memref<256x32xf32, #tpu.memory_space<vmem>>, vector<256x32xf32>
    %cst_10 = arith.constant dense<0.000000e+00> : vector<8x32xf32>
    %16 = tpu.matmul %14, %15, %cst_10 {dimension_numbers = #tpu.dot_dimension_numbers<[1], [0], [0], [1], [0, 0, 1, 1], [], []>, precision = #tpu.contract_precision<fp32>} : vector<8x256xf32>, vector<256x32xf32>, vector<8x32xf32> -> vector<8x32xf32>
    %c0_11 = arith.constant 0 : index
    %c0_12 = arith.constant 0 : index
    %17 = vector.load %arg5[%c0_11, %c0_12] : memref<8x32xf32, #tpu.memory_space<vmem>>, vector<8x32xf32>
    tpu.vector_store %arg5[%c0_11, %c0_12], %16 {strides = array<i32>} : memref<8x32xf32, #tpu.memory_space<vmem>>, vector<8x32xf32>,
    return
  }
  func.func @transform_0(%arg0: i32) -> (i32, i32) {
    %c0_i32 = arith.constant 0 : i32
    %c0_i32_0 = arith.constant 0 : i32
    return %arg0, %c0_i32 : i32, i32
  }
  func.func @transform_1(%arg0: i32) -> (i32, i32) {
    %c0_i32 = arith.constant 0 : i32
    %c0_i32_0 = arith.constant 0 : i32
    %c0_i32_1 = arith.constant 0 : i32
    return %c0_i32, %c0_i32_0 : i32, i32
  }
  func.func @transform_2(%arg0: i32) -> (i32, i32) {
    %c0_i32 = arith.constant 0 : i32
    %c0_i32_0 = arith.constant 0 : i32
    %c0_i32_1 = arith.constant 0 : i32
    return %c0_i32, %c0_i32_0 : i32, i32
  }
  func.func @transform_3(%arg0: i32) -> (i32, i32) {
    %c0_i32 = arith.constant 0 : i32
    %c0_i32_0 = arith.constant 0 : i32
    %c0_i32_1 = arith.constant 0 : i32
    return %c0_i32, %c0_i32_0 : i32, i32
  }
  func.func @transform_4(%arg0: i32) -> (i32, i32) {
    %c0_i32 = arith.constant 0 : i32
    %c0_i32_0 = arith.constant 0 : i32
    return %arg0, %c0_i32 : i32, i32
  }
}

</mosaic_0001>

<bundles_post_ra>
// kernel: tpu_custom_call.1
= control target key start
LH: loop header
LB: loop body
LE: loop exit
PB: predicated region body
PF: predicated region fallthrough
CT: control target
= control target key end

     0   :  { %v2839_v16 = vmov 1983009808   ;;  %s4210_s0 = inlined_call_operand.vmem [shape: f32[2,256], index: 0, kind: input, shape index: {}]   ;;  %s4211_s1 = inlined_call_operand.vmem [shape: f32[256,8], index: 1, kind: input, shape index: {}]   ;;  %s4212_s2 = inlined_call_operand.vmem [shape: f32[8,256], index: 2, kind: input, shape index: {}]   ;;  %s4213_s3 = inlined_call_operand.vmem [shape: f32[256,32], index: 3, kind: input, shape index: {}]   ;;  %s4214_s4 = inlined_call_operand.hbm [shape: f32[8,32], index: 4, kind: output, shape index: {}]  }
   0x1   :  { %v53_v0 = vld [vmem:[%s4211_s1 + $0xf8] sm:$0xff]  ;;  %v52_v2 = vld [vmem:[%s4211_s1 + $0xf0] sm:$0xff]  ;;  %v51_v7 = vld [vmem:[%s4211_s1 + $0xe8] sm:$0xff]  ;;  %v2908_v17 = vunpack.c.l.s4 %v2839_v16 }
   0x2   :  { %v37_v1 = vld [vmem:[%s4211_s1 + $0x78] sm:$0xff]  ;;  %v2876_v3 = vand.u32 4294901760, %v53_v0  ;;  %v2880_v5 = vand.u32 4294901760, %v52_v2  ;;  %v36_v6 = vld [vmem:[%s4211_s1 + $0x70] sm:$0xff]  ;;  %v35_v8 = vld [vmem:[%s4211_s1 + $0x68] sm:$0xff]  ;;  %v2893_v11 = vand.u32 4294901760, %v51_v7 }
   0x3   :  { %v2878_v4 = vand.u32 4294901760, %v37_v1  ;;  %v2891_v10 = vand.u32 4294901760, %v36_v6  ;;  %v2895_v12 = vand.u32 4294901760, %v35_v8  ;;  %v50_v13 = vld [vmem:[%s4211_s1 + $0xe0] sm:$0xff]  ;;  %v2906_v15 = vld [vmem:[%s4211_s1 + $0xd8] sm:$0xff]  ;;  %v2929_v23 = vld [vmem:[%s4211_s1 + $0xd0] sm:$0xff] }
   0x4   :  { %v34_v14 = vld [vmem:[%s4211_s1 + $0x60] sm:$0xff]  ;;  %2384 = vmatprep.subr.mxu0 %v2876_v3  ;;  %v2911_v18 = vand.u32 4294901760, %v50_v13  ;;  %v2916_v20 = vand.u32 4294901760, %v2906_v15  ;;  %v2919_v21 = vsub.f32 %v53_v0, %v2876_v3  ;;  %v2924_v22 = vld [vmem:[%s4211_s1 + $0x58] sm:$0xff]  ;;  %v2934_v24 = vld [vmem:[%s4211_s1 + $0x50] sm:$0xff]  ;;  %v2944_v27 = vand.u32 4294901760, %v2929_v23 }
   0x5   :  { %v2913_v19 = vand.u32 4294901760, %v34_v14  ;;  %2385 = vmatpush3.msra.mxu0 %v2878_v4  ;;  %v2938_v25 = vand.u32 4294901760, %v2924_v22  ;;  %v2941_v26 = vsub.f32 %v37_v1, %v2878_v4  ;;  %v2947_v28 = vsub.f32 %v52_v2, %v2880_v5  ;;  %v2952_v29 = vld [vmem:[%s4211_s1 + $0xc8] sm:$0xff]  ;;  %v2962_v31 = vld [vmem:[%s4211_s1 + $0xc0] sm:$0xff]  ;;  %v3014_v49 = vld [vmem:[%s4211_s1 + $0xb8] sm:$0xff] }
   0x6   :  { %v2957_v30 = vld [vmem:[%s4211_s1 + $0x48] sm:$0xff]  ;;  %2386 = vmatprep.subr.mxu0 %v2880_v5  ;;  %v4227_v32 = vand.u32 4294901760, %v2919_v21  ;;  %v2967_v33 = vand.u32 4294901760, %v2934_v24  ;;  %v2970_v34 = vsub.f32 %v36_v6, %v2891_v10  ;;  %v2973_v35 = vand.u32 4294901760, %v2952_v29  ;;  %v2987_v40 = vld [vmem:[%s4211_s1 + $0x40] sm:$0xff]  ;;  %v3027_v54 = vld [vmem:[%s4211_s1 + $0x38] sm:$0xff] }
   0x7   :  { %2387 = vmatpush3.msra.mxu0 %v2891_v10  ;;  %v4226_v36 = vand.u32 4294901760, %v2941_v26  ;;  %v4224_v37 = vand.u32 4294901760, %v2947_v28  ;;  %v2979_v38 = vsub.f32 %v51_v7, %v2893_v11  ;;  %v2982_v39 = vand.u32 4294901760, %v2957_v30  ;;  %v3037_v59 = vld [vmem:[%s4211_s1 + $0xb0] sm:$0xff] }
   0x8   :  { %2388 = vmatprep.subr.mxu0 %v2893_v11  ;;  %v306_v41 = vsub.f32 %v2919_v21, %v4227_v32  ;;  %v4222_v42 = vand.u32 4294901760, %v2970_v34  ;;  %v2995_v43 = vsub.f32 %v35_v8, %v2895_v12  ;;  %v2998_v44 = vand.u32 4294901760, %v2962_v31  ;;  %v3052_v0 = vld [vmem:[%s4211_s1 + $0x30] sm:$0xff]  ;;  %v3068_v8 = vld [vmem:[%s4211_s1 + $0xa8] sm:$0xff] }
   0x9   :  { %4371 = vst [vmem:[#allocation5_spill] sm:$0xff] %v2982_v39  ;;  %2389 = vmatpush3.msra.mxu0 %v2895_v12  ;;  %v194_v45 = vsub.f32 %v2941_v26, %v4226_v36  ;;  %v313_v46 = vsub.f32 %v2947_v28, %v4224_v37  ;;  %v4221_v47 = vand.u32 4294901760, %v2979_v38  ;;  %v3009_v48 = vsub.f32 %v50_v13, %v2911_v18 }
   0xa   :  { %4372 = vst [vmem:[#allocation6_spill] sm:$0xff] %v2998_v44  ;;  %2390 = vmatprep.subr.mxu0 %v2911_v18  ;;  %v307_v50 = vand.u32 4294901760, %v306_v41  ;;  %v201_v51 = vsub.f32 %v2970_v34, %v4222_v42  ;;  %v4219_v52 = vand.u32 4294901760, %v2995_v43  ;;  %v3022_v53 = vand.u32 4294901760, %v2987_v40  ;;  %v3082_v41 = vld [vmem:[%s4211_s1 + $0x28] sm:$0xff] }
   0xb   :  { %2391 = vmatpush3.msra.mxu0 %v2913_v19  ;;  %v195_v55 = vand.u32 4294901760, %v194_v45  ;;  %v314_v56 = vand.u32 4294901760, %v313_v46  ;;  %v320_v57 = vsub.f32 %v2979_v38, %v4221_v47  ;;  %v4217_v58 = vand.u32 4294901760, %v3009_v48 }
   0xc   :  { %4373 = vst [vmem:[#allocation7_spill] sm:$0xff] %v3022_v53  ;;  %2392 = vmatprep.subr.mxu0 %v2916_v20  ;;  %2419 = vmatprep.subr.mxu1 %v307_v50  ;;  %v202_v60 = vand.u32 4294901760, %v201_v51  ;;  %v208_v61 = vsub.f32 %v2995_v43, %v4219_v52  ;;  %v3044_v62 = vsub.f32 %v34_v14, %v2913_v19  ;;  %v3047_v63 = vand.u32 4294901760, %v3014_v49 }
   0xd   :  { %2393 = vmatpush3.msra.mxu0 %v2938_v25  ;;  %2420 = vmatpush3.msra.mxu1 %v195_v55  ;;  %v321_v1 = vand.u32 4294901760, %v320_v57  ;;  %v327_v2 = vsub.f32 %v3009_v48, %v4217_v58  ;;  %v3060_v6 = vsub.f32 %v2906_v15, %v2916_v20  ;;  %v3063_v7 = vand.u32 4294901760, %v3027_v54 }
   0xe   :  { %4374 = vst [vmem:[#allocation8_spill] sm:$0xff] %v3047_v63  ;;  %2394 = vmatprep.subr.mxu0 %v2944_v27  ;;  %2421 = vmatprep.subr.mxu1 %v314_v56  ;;  %v209_v13 = vand.u32 4294901760, %v208_v61  ;;  %v4215_v14 = vand.u32 4294901760, %v3044_v62  ;;  %v3074_v16 = vsub.f32 %v2924_v22, %v2938_v25  ;;  %v3077_v15 = vand.u32 4294901760, %v3037_v59 }
   0xf   :  { %4375 = vst [vmem:[#allocation9_spill] sm:$0xff] %v3063_v7 }
  0x10   :  { %4376 = vst [vmem:[#allocation10_spill] sm:$0xff] %v3077_v15 }
  0x11   :  { %9 = vsyncpa [#allocation3], 0  ;;  %2395 = vmatpush3.msra.mxu0 %v2967_v33  ;;  %2422 = vmatpush3.msra.mxu1 %v202_v60  ;;  %v328_v45 = vand.u32 4294901760, %v327_v2  ;;  %v4216_v46 = vand.u32 4294901760, %v3060_v6  ;;  %v3088_v50 = vsub.f32 %v2929_v23, %v2944_v27  ;;  %v3091_v22 = vand.u32 4294901760, %v3052_v0  ;;  %v3108_v23 = vld [vmem:[%s4211_s1 + $0xa0] sm:$0xff] }
  0x12   :  { %2396 = vmatprep.subr.mxu0 %v2973_v35  ;;  %2423 = vmatprep.subr.mxu1 %v321_v1  ;;  %v215_v51 = vsub.f32 %v3044_v62, %v4215_v14  ;;  %v4218_v55 = vand.u32 4294901760, %v3074_v16  ;;  %v3100_v56 = vsub.f32 %v2934_v24, %v2967_v33  ;;  %v3103_v57 = vand.u32 4294901760, %v3068_v8  ;;  %v3161_v42 = vld [vmem:[%s4211_s1 + $0x18] sm:$0xff]  ;;  %v3177_v37 = vld [vmem:[%s4211_s1 + $0x90] sm:$0xff]  ;;  %v3204_v9 = vld [vmem:[%s4211_s1 + $0x88] sm:$0xff] }
  0x13   :  { %4377 = vst [vmem:[#allocation11_spill] sm:$0xff] %v3091_v22  ;;  %2397 = vmatpush3.msra.mxu0 %v2982_v39  ;;  %2424 = vmatpush3.msra.mxu1 %v209_v13  ;;  %v334_v60 = vsub.f32 %v3060_v6, %v4216_v46  ;;  %v4220_v61 = vand.u32 4294901760, %v3088_v50  ;;  %v3117_v24 = vsub.f32 %v2952_v29, %v2973_v35  ;;  %v3120_v1 = vand.u32 4294901760, %v3082_v41  ;;  %v3134_v29 = vld [vmem:[%s4211_s1 + $0x20] sm:$0xff] }
  0x14   :  { %4378 = vst [vmem:[#allocation12_spill] sm:$0xff] %v3103_v57  ;;  %2398 = vmatprep.subr.mxu0 %v2998_v44  ;;  %2425 = vmatprep.subr.mxu1 %v328_v45  ;;  %v216_v2 = vand.u32 4294901760, %v215_v51  ;;  %v222_v13 = vsub.f32 %v3074_v16, %v4218_v55  ;;  %v4223_v14 = vand.u32 4294901760, %v3100_v56  ;;  %v3129_v46 = vsub.f32 %v2957_v30, %v2982_v39  ;;  %v3147_v30 = vld [vmem:[%s4211_s1 + $0x98] sm:$0xff] }
  0x15   :  { %4379 = vst [vmem:[#allocation13_spill] sm:$0xff] %v3120_v1  ;;  %2399 = vmatpush3.msra.mxu0 %v3022_v53  ;;  %v335_v58 = vand.u32 4294901760, %v334_v60  ;;  %v341_v45 = vsub.f32 %v3088_v50, %v4220_v61  ;;  %v4225_v51 = vand.u32 4294901760, %v3117_v24  ;;  %v3142_v55 = vand.u32 4294901760, %v3108_v23 }
  0x16   :  { %4380 = vst [vmem:[#allocation14_spill] sm:$0xff] %v3129_v46  ;;  %2426 = vmatpush3.msra.mxu1 %v216_v2  ;;  %2400 = vmatprep.subr.mxu0 %v3047_v63  ;;  %v223_v52 = vand.u32 4294901760, %v222_v13  ;;  %v229_v60 = vsub.f32 %v3100_v56, %v4223_v14  ;;  %v4228_v61 = vand.u32 4294901760, %v3129_v46  ;;  %v3156_v47 = vsub.f32 %v2962_v31, %v2998_v44 }
  0x17   :  { %4381 = vst [vmem:[#allocation15_spill] sm:$0xff] %v3142_v55  ;;  %2427 = vmatprep.subr.mxu1 %v335_v58  ;;  %2401 = vmatpush3.msra.mxu0 %v3063_v7  ;;  %v342_v2 = vand.u32 4294901760, %v341_v45  ;;  %v348_v13 = vsub.f32 %v3117_v24, %v4225_v51  ;;  %v3168_v14 = vand.u32 4294901760, %v3134_v29  ;;  %v3172_v31 = vsub.f32 %v2987_v40, %v3022_v53  ;;  %v3190_v40 = vld [vmem:[%s4211_s1 + $0x10] sm:$0xff] }
  0x18   :  { %4382 = vst [vmem:[#allocation16_spill] sm:$0xff] %v3156_v47  ;;  %2428 = vmatpush3.msra.mxu1 %v223_v52  ;;  %2402 = vmatprep.subr.mxu0 %v3077_v15  ;;  %v230_v58 = vand.u32 4294901760, %v229_v60  ;;  %v236_v45 = vsub.f32 %v3129_v46, %v4228_v61  ;;  %v4233_v51 = vand.u32 4294901760, %v3156_v47  ;;  %v3185_v36 = vand.u32 4294901760, %v3147_v30 }
  0x19   :  { %4383 = vst [vmem:[#allocation17_spill] sm:$0xff] %v3168_v14  ;;  %4384 = vst [vmem:[#allocation18_spill] sm:$0xff] %v3172_v31  ;;  %2429 = vmatprep.subr.mxu1 %v342_v2  ;;  %2403 = vmatpush3.msra.mxu0 %v3091_v22  ;;  %v349_v52 = vand.u32 4294901760, %v348_v13  ;;  %v3196_v32 = vsub.f32 %v3014_v49, %v3047_v63  ;;  %v3199_v61 = vand.u32 4294901760, %v3161_v42  ;;  %v3215_v60 = vand.u32 4294901760, %v3177_v37 }
  0x1a   :  { %2430 = vmatpush3.msra.mxu1 %v230_v58  ;;  %2404 = vmatprep.subr.mxu0 %v3103_v57  ;;  %v237_v2 = vand.u32 4294901760, %v236_v45  ;;  %v355_v13 = vsub.f32 %v3156_v47, %v4233_v51  ;;  %v3212_v49 = vsub.f32 %v3027_v54, %v3063_v7  ;;  %v4389_v63 = vand.u32 4294901760, %v3172_v31  ;;  %v3232_v54 = vld [vmem:[%s4211_s1 + $0x8] sm:$0xff] }
  0x1b   :  { %4385 = vst [vmem:[#allocation19_spill] sm:$0xff] %v3196_v32  ;;  %4386 = vst [vmem:[#allocation20_spill] sm:$0xff] %v3199_v61  ;;  %2431 = vmatprep.subr.mxu1 %v349_v52  ;;  %2405 = vmatpush3.msra.mxu0 %v3120_v1  ;;  %v3224_v53 = vsub.f32 %v3037_v59, %v3077_v15  ;;  %v3227_v51 = vand.u32 4294901760, %v3190_v40  ;;  %v3238_v45 = vsub.f32 %v3052_v0, %v3091_v22  ;;  %v3246_v15 = vld [vmem:[%s4211_s1 + $0x80] sm:$0xff]  ;;  %vm940_vm0 = vcmask 64512  }
  0x1c   :  { %4387 = vst [vmem:[#allocation21_spill] sm:$0xff] %v3212_v49  ;;  %4388 = vst [vmem:[#allocation22_spill] sm:$0xff] %v3215_v60  ;;  %v243_v58 = vsub.f32 %v3172_v31, %v4389_v63  ;;  %2432 = vmatpush3.msra.mxu1 %v237_v2  ;;  %2406 = vmatprep.subr.mxu0 %v3142_v55  ;;  %v356_v52 = vand.u32 4294901760, %v355_v13  ;;  %v3241_v59 = vand.u32 4294901760, %v3204_v9  ;;  %v4394_v7 = vand.u32 4294901760, %v3196_v32 }
  0x1d   :  { %4390 = vst [vmem:[#allocation23_spill] sm:$0xff] %v3224_v53  ;;  %4391 = vst [vmem:[#allocation24_spill] sm:$0xff] %v3227_v51  ;;  %2407 = vmatpush3.msra.mxu0 %v3168_v14  ;;  %v4252_v63 = vand.u32 4294901760, %v3224_v53  ;;  %v3255_v0 = vsub.f32 %v3068_v8, %v3103_v57  ;;  %v4396_v22 = vand.u32 4294901760, %v3212_v49  ;;  %v3272_v8 = vld [vmem:[%s4211_s1] sm:$0xff]  ;;  %vm2368_vm1 = vcmask 261120  }
  0x1e   :  { %4392 = vst [vmem:[#allocation25_spill] sm:$0xff] %v3238_v45  ;;  %4393 = vst [vmem:[#allocation26_spill] sm:$0xff] %v3241_v59  ;;  %v244_v2 = vand.u32 4294901760, %v243_v58  ;;  %v362_v13 = vsub.f32 %v3196_v32, %v4394_v7  ;;  %2433 = vmatprep.subr.mxu1 %v356_v52  ;;  %2408 = vmatprep.subr.mxu0 %v3185_v36  ;;  %v3263_v58 = vand.u32 4294901760, %v3232_v54  ;;  %v18_v52 = vld [vmem:[%s4210_s0] sm:$0xf] }
  0x1f   :  { %4395 = vst [vmem:[#allocation27_spill] sm:$0xff] %v3255_v0  ;;  %v250_v31 = vsub.f32 %v3212_v49, %v4396_v22  ;;  %v3267_v7 = vsub.f32 %v3082_v41, %v3120_v1  ;;  %2409 = vmatpush3.msra.mxu0 %v3199_v61  ;;  %v369_v44 = vsub.f32 %v3224_v53, %v4252_v63  ;;  %v3283_v1 = vand.u32 4294901760, %v3246_v15  ;;  %v19_v57 = vld [vmem:[%s4210_s0 + $0x4] sm:$0xf]  ;;  %v20_v41 = vld [vmem:[%s4210_s0 + $0x8] sm:$0xf] }
  0x20   :  { %4397 = vst [vmem:[#allocation28_spill] sm:$0xff] %v3263_v58  ;;  %2434 = vmatpush3.msra.mxu1 %v244_v2  ;;  %v363_v22 = vand.u32 4294901760, %v362_v13  ;;  %2410 = vmatprep.subr.mxu0 %v3215_v60  ;;  %v4399_v2 = vand.u32 4294901760, %v3238_v45  ;;  %v3295_v63 = vsub.f32 %v3108_v23, %v3142_v55  ;;  %v3312_v23 = vsub.f32 %v3134_v29, %v3168_v14 }
  0x21   :  { %4398 = vst [vmem:[#allocation29_spill] sm:$0xff] %v3283_v1  ;;  %v251_v49 = vand.u32 4294901760, %v250_v31  ;;  %v21_v31 = vld [vmem:[%s4210_s0 + $0xc] sm:$0xf]  ;;  %v370_v53 = vand.u32 4294901760, %v369_v44  ;;  %2411 = vmatpush3.msra.mxu0 %v3227_v51  ;;  %v58_v39 = vcombine.low %v18_v52, %v19_v57  ;;  %v62_v29 = vunpack.c.0.s8 %v2908_v17 }
  0x22   :  { %v257_v13 = vsub.f32 %v3238_v45, %v4399_v2  ;;  %2435 = vmatprep.subr.mxu1 %v363_v22  ;;  %v4400_v2 = vand.u32 4294901760, %v3255_v0  ;;  %v3308_v45 = vand.u32 4294901760, %v3272_v8  ;;  %2412 = vmatprep.subr.mxu0 %v3241_v59  ;;  %v4401_v22 = vand.u32 4294901760, %v3267_v7 }
  0x23   :  { %2436 = vmatpush3.msra.mxu1 %v251_v49  ;;  %v4273_v47 = vand.u32 4294901760, %v3295_v63  ;;  %2413 = vmatpush3.msra.mxu0 %v3263_v58  ;;  %v59_v46 = vcombine.low %v20_v41, %v21_v31  ;;  %v3349_v41 = vsub.f32 %v3190_v40, %v3227_v51 }
  0x24   :  { %v376_v32 = vsub.f32 %v3255_v0, %v4400_v2  ;;  %v258_v55 = vand.u32 4294901760, %v257_v13  ;;  %v264_v44 = vsub.f32 %v3267_v7, %v4401_v22  ;;  %2437 = vmatprep.subr.mxu1 %v370_v53  ;;  %v4272_v0 = vand.u32 4294901760, %v3312_v23  ;;  %2414 = vmatprep.subr.mxu0 %v3283_v1 }
  0x25   :  { %v383_v13 = vsub.f32 %v3295_v63, %v4273_v47  ;;  %v4402_v22 = vlaneseq  ;;  %2415 = vmatpush3.msra.mxu0 %v3308_v45  ;;  %v3337_v53 = vsub.f32 %v3161_v42, %v3199_v61  ;;  %v4278_v40 = vand.u32 4294901760, %v3349_v41 }
  0x26   :  { %v377_v2 = vand.u32 4294901760, %v376_v32  ;;  %2438 = vmatpush3.msra.mxu1 %v258_v55  ;;  %v265_v49 = vand.u32 4294901760, %v264_v44  ;;  %v3329_v32 = vsub.f32 %v3147_v30, %v3185_v36  ;;  %v271_v17 = vsub.f32 %v3312_v23, %v4272_v0  ;;  %2454 = vmatprep.subr.mxu0 %v2919_v21 }
  0x27   :  { %v64_v14 = vshrl.u32 %v4402_v22, 7  ;;  %v3341_v55 = vsub.f32 %v3177_v37, %v3215_v60  ;;  %v384_v57 = vand.u32 4294901760, %v383_v13  ;;  %v4270_v42 = vand.u32 4294901760, %v3337_v53 }
  0x28   :  { %2439 = vmatprep.subr.mxu1 %v377_v2  ;;  %v4269_v30 = vand.u32 4294901760, %v3329_v32  ;;  %v272_v31 = vand.u32 4294901760, %v271_v17  ;;  %v3355_v37 = vsub.f32 %v3204_v9, %v3241_v59 }
  0x29   :  { %2440 = vmatpush3.msra.mxu1 %v265_v49  ;;  %v3343_v52 = vsub.s32 %v62_v29, %v64_v14  ;;  %v4271_v44 = vand.u32 4294901760, %v3341_v55  ;;  %v278_v49 = vsub.f32 %v3337_v53, %v4270_v42 }
  0x2a   :  { %2441 = vmatprep.subr.mxu1 %v384_v57  ;;  %v390_v29 = vsub.f32 %v3329_v32, %v4269_v30  ;;  %v4275_v13 = vand.u32 4294901760, %v3355_v37  ;;  %v285_v57 = vsub.f32 %v3349_v41, %v4278_v40  ;;  %v4417_v40 = vld [vmem:[#allocation10_spill] sm:$0xff] }
  0x2b   :  { %4403 = vst [vmem:[#allocation30_spill] sm:$0xff] %v3343_v52  ;;  %v66_v14 = vrot.slane %v58_v39, %v3343_v52  ;;  %v73_v2 = vrot.slane %v59_v46, %v3343_v52  ;;  %2442 = vmatpush3.msra.mxu1 %v272_v31  ;;  %v397_v9 = vsub.f32 %v3341_v55, %v4271_v44  ;;  %v279_v31 = vand.u32 4294901760, %v278_v49  ;;  %v4420_v52 = vld [vmem:[#allocation27_spill] sm:$0xff] }
  0x2c   :  { %v3372_v39 = vsub.f32 %v3232_v54, %v3263_v58  ;;  %v391_v22 = vand.u32 4294901760, %v390_v29  ;;  %v404_v42 = vsub.f32 %v3355_v37, %v4275_v13  ;;  %v286_v47 = vand.u32 4294901760, %v285_v57 }
  0x2d   :  { %v75_v46 = vcombine.high %v66_v14, %v73_v2  ;;  %v74_v17 = vcombine.low %v66_v14, %v73_v2  ;;  %v398_v30 = vand.u32 4294901760, %v397_v9  ;;  %v3387_v14 = vsub.f32 %v3246_v15, %v3283_v1 }
  0x2e   :  { %v4274_v44 = vand.u32 4294901760, %v3372_v39  ;;  %2443 = vmatprep.subr.mxu1 %v391_v22  ;;  %v405_v2 = vand.u32 4294901760, %v404_v42  ;;  %v3394_v49 = vsub.f32 %v3272_v8, %v3308_v45 }
  0x2f   :  { %v3381_v0 = vand.u32 4294901760, %v75_v46  ;;  %v3383_v54 = vand.u32 4294901760, %v74_v17  ;;  %2444 = vmatpush3.msra.mxu1 %v279_v31  ;;  %v4277_v15 = vand.u32 4294901760, %v3387_v14 }
  0x30   :  { %v292_v29 = vsub.f32 %v3372_v39, %v4274_v44  ;;  %2445 = vmatprep.subr.mxu1 %v398_v30  ;;  %v4276_v57 = vand.u32 4294901760, %v3394_v49 }
  0x31   :  { %4404 = vst [vmem:[#allocation31_spill] sm:$0xff] %v3381_v0  ;;  %4405 = vst [vmem:[#allocation32_spill] sm:$0xff] %v3383_v54  ;;  %v3397_v9 = vsub.f32 %v75_v46, %v3381_v0  ;;  %v3400_v22 = vsub.f32 %v74_v17, %v3383_v54  ;;  %415 = vmatprep.mubr.f32.mxu1 %v3381_v0  ;;  %2446 = vmatpush3.msra.mxu1 %v286_v47  ;;  %v4422_v0 = vld [vmem:[#allocation13_spill] sm:$0xff] }
  0x32   :  { %v293_v42 = vand.u32 4294901760, %v292_v29  ;;  %2447 = vmatprep.subr.mxu1 %v405_v2  ;;  %v411_v46 = vsub.f32 %v3387_v14, %v4277_v15  ;;  %v299_v30 = vsub.f32 %v3394_v49, %v4276_v57  ;;  %v4415_v57 = vld [vmem:[#allocation9_spill] sm:$0xff]  ;;  %v4416_v15 = vld [vmem:[#allocation23_spill] sm:$0xff] }
  0x33   :  { %v4280_v31 = vand.u32 4294901760, %v3397_v9  ;;  %v4279_v8 = vand.u32 4294901760, %v3400_v22 }
  0x34   :  { %2448 = vmatpush3.msra.mxu1 %v293_v42  ;;  %v412_v29 = vand.u32 4294901760, %v411_v46  ;;  %v300_v44 = vand.u32 4294901760, %v299_v30  ;;  %v4408_v42 = vld [vmem:[#allocation16_spill] sm:$0xff]  ;;  %v4409_v46 = vld [vmem:[#allocation6_spill] sm:$0xff] }
  0x35   :  { %v177_v47 = vsub.f32 %v3397_v9, %v4280_v31  ;;  %v183_v17 = vsub.f32 %v3400_v22, %v4279_v8  ;;  %v4410_v30 = vld [vmem:[#allocation18_spill] sm:$0xff]  ;;  %v4418_v8 = vld [vmem:[#allocation25_spill] sm:$0xff]  ;;  %v4419_v31 = vld [vmem:[#allocation11_spill] sm:$0xff] }
  0x36   :  { %2449 = vmatprep.subr.mxu1 %v412_v29  ;;  %v4413_v29 = vld [vmem:[#allocation8_spill] sm:$0xff] }
  0x37   :  { %v178_v2 = vand.u32 4294901760, %v177_v47  ;;  %v184_v13 = vand.u32 4294901760, %v183_v17  ;;  %2450 = vmatpush3.msra.mxu1 %v300_v44  ;;  %v4406_v44 = vld [vmem:[#allocation14_spill] sm:$0xff]  ;;  %v4411_v47 = vld [vmem:[#allocation7_spill] sm:$0xff] }
  0x38   :  { %417 = vmatmul.mubr.f32.vlgmr.msra.gmra.mxu1 %v3383_v54  ;;  %2489 = vmatprep.subr.mxu1 %v2876_v3  ;;  %v4412_v17 = vld [vmem:[#allocation19_spill] sm:$0xff]  ;;  %v4421_v54 = vld [vmem:[#allocation12_spill] sm:$0xff] }
  0x39   :  { %179 = vmatprep.mubr.f32.mxu0 %v178_v2  ;;  %2490 = vmatpush3.msra.mxu1 %v2878_v4  ;;  %v4414_v2 = vld [vmem:[#allocation21_spill] sm:$0xff] }
  0x3a   :  { %185 = vmatmul.mubr.f32.vlgmr.msra.gmra.mxu0 %v184_v13  ;;  %2491 = vmatprep.subr.mxu1 %v2880_v5  ;;  %v4407_v13 = vld [vmem:[#allocation5_spill] sm:$0xff] }
  0x3b   :  { %2455 = vmatpush3.msra.mxu0 %v2941_v26  ;;  %2492 = vmatpush3.msra.mxu1 %v2891_v10 }
  0x3c   :  { %2456 = vmatprep.subr.mxu0 %v2947_v28  ;;  %2493 = vmatprep.subr.mxu1 %v2893_v11 }
  0x3d   :  { %2457 = vmatpush3.msra.mxu0 %v2970_v34  ;;  %2494 = vmatpush3.msra.mxu1 %v2895_v12 }
  0x3e   :  { %2458 = vmatprep.subr.mxu0 %v2979_v38  ;;  %2495 = vmatprep.subr.mxu1 %v2911_v18 }
  0x3f   :  { %2459 = vmatpush3.msra.mxu0 %v2995_v43  ;;  %2496 = vmatpush3.msra.mxu1 %v2913_v19 }
  0x40   :  { %2460 = vmatprep.subr.mxu0 %v3009_v48  ;;  %2497 = vmatprep.subr.mxu1 %v2916_v20 }
  0x41   :  { %2461 = vmatpush3.msra.mxu0 %v3044_v62  ;;  %2498 = vmatpush3.msra.mxu1 %v2938_v25 }
  0x42   :  { %2462 = vmatprep.subr.mxu0 %v3060_v6  ;;  %2499 = vmatprep.subr.mxu1 %v2944_v27 }
  0x43   :  { %2463 = vmatpush3.msra.mxu0 %v3074_v16  ;;  %2500 = vmatpush3.msra.mxu1 %v2967_v33 }
  0x44   :  { %2464 = vmatprep.subr.mxu0 %v3088_v50  ;;  %2501 = vmatprep.subr.mxu1 %v2973_v35 }
  0x45   :  { %2465 = vmatpush3.msra.mxu0 %v3100_v56  ;;  %2502 = vmatpush3.msra.mxu1 %v4407_v13 }
  0x46   :  { %2466 = vmatprep.subr.mxu0 %v3117_v24  ;;  %2503 = vmatprep.subr.mxu1 %v4409_v46 }
  0x47   :  { %2467 = vmatpush3.msra.mxu0 %v4406_v44  ;;  %2504 = vmatpush3.msra.mxu1 %v4411_v47 }
  0x48   :  { %2468 = vmatprep.subr.mxu0 %v4408_v42  ;;  %2505 = vmatprep.subr.mxu1 %v4413_v29  ;;  %v4423_v29 = vld [vmem:[#allocation15_spill] sm:$0xff] }
  0x49   :  { %2469 = vmatpush3.msra.mxu0 %v4410_v30  ;;  %2506 = vmatpush3.msra.mxu1 %v4415_v57 }
  0x4a   :  { %2470 = vmatprep.subr.mxu0 %v4412_v17  ;;  %2507 = vmatprep.subr.mxu1 %v4417_v40  ;;  %v4424_v40 = vld [vmem:[#allocation17_spill] sm:$0xff] }
  0x4b   :  { %2471 = vmatpush3.msra.mxu0 %v4414_v2  ;;  %2508 = vmatpush3.msra.mxu1 %v4419_v31 }
  0x4c   :  { %2472 = vmatprep.subr.mxu0 %v4416_v15  ;;  %2509 = vmatprep.subr.mxu1 %v4421_v54 }
  0x4d   :  { %2473 = vmatpush3.msra.mxu0 %v4418_v8  ;;  %2510 = vmatpush3.msra.mxu1 %v4422_v0 }
  0x4e   :  { %2474 = vmatprep.subr.mxu0 %v4420_v52  ;;  %2511 = vmatprep.subr.mxu1 %v4423_v29 }
  0x4f   :  { %2475 = vmatpush3.msra.mxu0 %v3267_v7  ;;  %552 = vmatprep.mubr.f32.mxu0 %v3397_v9 }
  0x50   :  { %2476 = vmatprep.subr.mxu0 %v3295_v63  ;;  %2512 = vmatpush3.msra.mxu1 %v4424_v40 }
  0x51   :  { %2477 = vmatpush3.msra.mxu0 %v3312_v23  ;;  %2513 = vmatprep.subr.mxu1 %v3185_v36 }
  0x52   :  { %2478 = vmatprep.subr.mxu0 %v3329_v32  ;;  %2514 = vmatpush3.msra.mxu1 %v3199_v61  ;;  %v4426_v61 = vand.u32 4294901760, %v2941_v26  ;;  %v4432_v26 = vand.u32 4294901760, %v2995_v43  ;;  %v4448_v43 = vld [vmem:[#allocation8_spill] sm:$0xff] }
  0x53   :  { %2479 = vmatpush3.msra.mxu0 %v3337_v53  ;;  %2515 = vmatprep.subr.mxu1 %v3215_v60  ;;  %v4425_v60 = vand.u32 4294901760, %v2919_v21  ;;  %v4431_v21 = vand.u32 4294901760, %v2979_v38  ;;  %v4435_v38 = vand.u32 4294901760, %v3060_v6  ;;  %v4452_v6 = vand.u32 4294901760, %v3312_v23  ;;  %v4466_v23 = vld [vmem:[#allocation26_spill] sm:$0xff] }
  0x54   :  { %2480 = vmatprep.subr.mxu0 %v3341_v55  ;;  %2516 = vmatpush3.msra.mxu1 %v3227_v51  ;;  %v4428_v51 = vand.u32 4294901760, %v3397_v9 }
  0x55   :  { %2481 = vmatpush3.msra.mxu0 %v3349_v41  ;;  %2517 = vmatprep.subr.mxu1 %v3241_v59  ;;  %v4427_v59 = vand.u32 4294901760, %v2947_v28  ;;  %v4433_v28 = vand.u32 4294901760, %v3009_v48  ;;  %v4450_v48 = vand.u32 4294901760, %v3295_v63  ;;  %v4461_v63 = vld [vmem:[#allocation20_spill] sm:$0xff] }
  0x56   :  { %2482 = vmatprep.subr.mxu0 %v3355_v37  ;;  %2518 = vmatpush3.msra.mxu1 %v3263_v58  ;;  %v4429_v58 = vand.u32 4294901760, %v2970_v34  ;;  %v4434_v34 = vand.u32 4294901760, %v3044_v62  ;;  %v4451_v62 = vld [vmem:[#allocation10_spill] sm:$0xff] }
  0x57   :  { %2483 = vmatpush3.msra.mxu0 %v3372_v39  ;;  %2519 = vmatprep.subr.mxu1 %v3283_v1  ;;  %v4430_v1 = vand.u32 4294901760, %v3400_v22 }
  0x58   :  { %2484 = vmatprep.subr.mxu0 %v3387_v14  ;;  %2520 = vmatpush3.msra.mxu1 %v3308_v45 }
  0x59   :  { %2485 = vmatpush3.msra.mxu0 %v3394_v49  ;;  %659 = vmatprep.mubr.f32.mxu1 %v4428_v51  ;;  %v4459_v51 = vand.u32 4294901760, %v3372_v39 }
  0x5a   :  { %555 = vmatmul.mubr.f32.vlgmr.msra.gmra.mxu0 %v3400_v22  ;;  %2524 = vmatprep.subr.mxu0 %v4425_v60  ;;  %v4460_v60 = vand.u32 4294901760, %v3387_v14 }
  0x5b   :  { %2525 = vmatpush3.msra.mxu0 %v4426_v61  ;;  %663 = vmatmul.mubr.f32.vlgmr.msra.gmra.mxu1 %v4430_v1  ;;  %v4456_v61 = vand.u32 4294901760, %v3349_v41  ;;  %v4458_v1 = vand.u32 4294901760, %v3355_v37 }
  0x5c   :  { %2526 = vmatprep.subr.mxu0 %v4427_v59  ;;  %2559 = vmatprep.subr.mxu1 %v2876_v3  ;;  %v4436_v3 = vand.u32 4294901760, %v3074_v16  ;;  %v4453_v16 = vand.u32 4294901760, %v3329_v32  ;;  %v4462_v59 = vand.u32 4294901760, %v3394_v49  ;;  %v4467_v32 = vld [vmem:[#allocation28_spill] sm:$0xff] }
  0x5d   :  { %2527 = vmatpush3.msra.mxu0 %v4429_v58  ;;  %2560 = vmatpush3.msra.mxu1 %v2878_v4  ;;  %v4437_v4 = vand.u32 4294901760, %v3088_v50  ;;  %v4454_v50 = vand.u32 4294901760, %v3337_v53  ;;  %v4464_v58 = vld [vmem:[#allocation32_spill] sm:$0xff] }
  0x5e   :  { %2528 = vmatprep.subr.mxu0 %v4431_v21  ;;  %2561 = vmatprep.subr.mxu1 %v2880_v5  ;;  %v4438_v5 = vand.u32 4294901760, %v3100_v56  ;;  %v4455_v56 = vand.u32 4294901760, %v3341_v55 }
  0x5f   :  { %2529 = vmatpush3.msra.mxu0 %v4432_v26  ;;  %2562 = vmatpush3.msra.mxu1 %v2891_v10  ;;  %v4439_v10 = vand.u32 4294901760, %v3117_v24  ;;  %v4457_v24 = vld [vmem:[#allocation31_spill] sm:$0xff] }
  0x60   :  { %2530 = vmatprep.subr.mxu0 %v4433_v28  ;;  %2563 = vmatprep.subr.mxu1 %v2893_v11  ;;  %v4440_v11 = vand.u32 4294901760, %v4406_v44 }
  0x61   :  { %2531 = vmatpush3.msra.mxu0 %v4434_v34  ;;  %2564 = vmatpush3.msra.mxu1 %v2895_v12  ;;  %v4441_v12 = vand.u32 4294901760, %v4408_v42  ;;  %v953_v34 = vld [vmem:[%s4212_s2 + $0x8] sm:$0xff] }
  0x62   :  { %2532 = vmatprep.subr.mxu0 %v4435_v38  ;;  %2565 = vmatprep.subr.mxu1 %v2911_v18  ;;  %v4442_v18 = vand.u32 4294901760, %v4410_v30  ;;  %v952_v38 = vld [vmem:[%s4212_s2] sm:$0xff] }
  0x63   :  { %2533 = vmatpush3.msra.mxu0 %v4436_v3  ;;  %2566 = vmatpush3.msra.mxu1 %v2913_v19  ;;  %v4443_v19 = vand.u32 4294901760, %v4412_v17  ;;  %v987_v3 = vand.u32 4294901760, %v953_v34 }
  0x64   :  { %2534 = vmatprep.subr.mxu0 %v4437_v4  ;;  %2567 = vmatprep.subr.mxu1 %v2916_v20  ;;  %v4444_v20 = vand.u32 4294901760, %v4414_v2  ;;  %v989_v4 = vand.u32 4294901760, %v952_v38 }
  0x65   :  { %2535 = vmatpush3.msra.mxu0 %v4438_v5  ;;  %2568 = vmatpush3.msra.mxu1 %v2938_v25  ;;  %v4445_v25 = vand.u32 4294901760, %v4416_v15  ;;  %v2840_v5 = vmov 0.0  }
  0x66   :  { %2536 = vmatprep.subr.mxu0 %v4439_v10  ;;  %2569 = vmatprep.subr.mxu1 %v2944_v27  ;;  %v4446_v27 = vand.u32 4294901760, %v4418_v8  ;;  %v1066_v10 = vsub.f32 %v953_v34, %v987_v3 }
  0x67   :  { %2537 = vmatpush3.msra.mxu0 %v4440_v11  ;;  %2570 = vmatpush3.msra.mxu1 %v2967_v33  ;;  %v4447_v33 = vand.u32 4294901760, %v4420_v52  ;;  %v1072_v11 = vsub.f32 %v952_v38, %v989_v4  ;;  %v1460_v38 = vld [vmem:[%s4213_s3 + $0x50] sm:$0xff] }
  0x68   :  { %2538 = vmatprep.subr.mxu0 %v4441_v12  ;;  %2571 = vmatprep.subr.mxu1 %v2973_v35  ;;  %v4449_v35 = vand.u32 4294901760, %v3267_v7  ;;  %v4465_v7 = vld [vmem:[#allocation24_spill] sm:$0xff]  ;;  %v1067_v12 = vand.u32 4294901760, %v1066_v10 }
  0x69   :  { %2539 = vmatpush3.msra.mxu0 %v4442_v18  ;;  %2572 = vmatpush3.msra.mxu1 %v4407_v13  ;;  %v1073_v18 = vand.u32 4294901760, %v1072_v11 }
  0x6a   :  { %2540 = vmatprep.subr.mxu0 %v4443_v19  ;;  %2573 = vmatprep.subr.mxu1 %v4409_v46  ;;  %v1068_v19 = vsub.f32 %v1066_v10, %v1067_v12 }
  0x6b   :  { %2541 = vmatpush3.msra.mxu0 %v4444_v20  ;;  %2574 = vmatpush3.msra.mxu1 %v4411_v47  ;;  %v1074_v20 = vsub.f32 %v1072_v11, %v1073_v18 }
  0x6c   :  { %2542 = vmatprep.subr.mxu0 %v4445_v25  ;;  %2575 = vmatprep.subr.mxu1 %v4448_v43  ;;  %v1069_v25 = vand.u32 4294901760, %v1068_v19 }
  0x6d   :  { %2543 = vmatpush3.msra.mxu0 %v4446_v27  ;;  %2576 = vmatpush3.msra.mxu1 %v4415_v57  ;;  %v1075_v27 = vand.u32 4294901760, %v1074_v20 }
  0x6e   :  { %2544 = vmatprep.subr.mxu0 %v4447_v33  ;;  %2577 = vmatprep.subr.mxu1 %v4451_v62 }
  0x6f   :  { %2545 = vmatpush3.msra.mxu0 %v4449_v35  ;;  %2578 = vmatpush3.msra.mxu1 %v4419_v31 }
  0x70   :  { %2546 = vmatprep.subr.mxu0 %v4450_v48  ;;  %2579 = vmatprep.subr.mxu1 %v4421_v54 }
  0x71   :  { %2547 = vmatpush3.msra.mxu0 %v4452_v6  ;;  %2580 = vmatpush3.msra.mxu1 %v4422_v0  ;;  %v4463_v0 = vld [vmem:[#allocation22_spill] sm:$0xff] }
  0x72   :  { %2548 = vmatprep.subr.mxu0 %v4453_v16  ;;  %2581 = vmatprep.subr.mxu1 %v4423_v29 }
  0x73   :  { %2549 = vmatpush3.msra.mxu0 %v4454_v50  ;;  %829 = vmatprep.mubr.f32.mxu0 %v4457_v24 }
  0x74   :  { %2550 = vmatprep.subr.mxu0 %v4455_v56  ;;  %2582 = vmatpush3.msra.mxu1 %v4424_v40 }
  0x75   :  { %2551 = vmatpush3.msra.mxu0 %v4456_v61  ;;  %2583 = vmatprep.subr.mxu1 %v3185_v36  ;;  %v4468_v36 = vld [vmem:[#allocation29_spill] sm:$0xff]  ;;  %v1481_v61 = vld [vmem:[%s4213_s3 + $0xf8] sm:$0xff] }
  0x76   :  { %2552 = vmatprep.subr.mxu0 %v4458_v1  ;;  %2584 = vmatpush3.msra.mxu1 %v4461_v63  ;;  %v1465_v1 = vld [vmem:[%s4213_s3 + $0x78] sm:$0xff] }
  0x77   :  { %2553 = vmatpush3.msra.mxu0 %v4459_v51  ;;  %2585 = vmatprep.subr.mxu1 %v4463_v0  ;;  %v3606_v51 = vand.u32 4294901760, %v1465_v1  ;;  %v1464_v0 = vld [vmem:[%s4213_s3 + $0x70] sm:$0xff] }
  0x78   :  { %2554 = vmatprep.subr.mxu0 %v4460_v60  ;;  %2586 = vmatpush3.msra.mxu1 %v4465_v7  ;;  %v1480_v60 = vld [vmem:[%s4213_s3 + $0xf0] sm:$0xff]  ;;  %v3623_v7 = vand.u32 4294901760, %v1464_v0 }
  0x79   :  { %2555 = vmatpush3.msra.mxu0 %v4462_v59  ;;  %2587 = vmatprep.subr.mxu1 %v4466_v23  ;;  %v3614_v59 = vand.u32 4294901760, %v1480_v60  ;;  %v1479_v23 = vld [vmem:[%s4213_s3 + $0xe8] sm:$0xff] }
  0x7a   :  { %831 = vmatmul.mubr.f32.vlgmr.msra.gmra.mxu0 %v4464_v58  ;;  %933 = vmatprep.mubr.f32.mxu1 %v4457_v24  ;;  %v3601_v24 = vand.u32 4294901760, %v1481_v61 }
  0x7b   :  { %2588 = vmatpush3.msra.mxu1 %v4467_v32  ;;  %1023 = vmatprep.mubr.f32.mxu0 %v2840_v5 }
  0x7c   :  { %2589 = vmatprep.subr.mxu1 %v4468_v36  ;;  %988 = vmatprep.subr.mxu0 %v987_v3  ;;  %4469 = vst [vmem:[#allocation14_spill] sm:$0xff] %v3601_v24  ;;  %v3612_v63 = vsub.f32 %v1481_v61, %v3601_v24  ;;  %v3631_v36 = vsub.f32 %v1480_v60, %v3614_v59 }
  0x7d   :  { %2590 = vmatpush3.msra.mxu1 %v3308_v45  ;;  %990 = vmatpush1.msra.mxu0 %v989_v4 }
  0x7e   :  { %935 = vmatmul.mubr.f32.vlgmr.msra.gmra.mxu1 %v4464_v58  ;;  %1149 = vmatprep.subr.mxu0 %v1066_v10  ;;  %4470 = vst [vmem:[#allocation5_spill] sm:$0xff] %v3612_v63  ;;  %v3621_v58 = vsub.f32 %v1465_v1, %v3606_v51  ;;  %v4312_v32 = vand.u32 4294901760, %v3612_v63 }
  0x7f   :  { %1109 = vmatprep.mubr.f32.mxu1 %v2840_v5  ;;  %1070 = vmatprep.subr.mxu1 %v1069_v25  ;;  %v1459_v25 = vld [vmem:[%s4213_s3 + $0x48] sm:$0xff] }
  0x80   :  { %1076 = vmatpush1.msra.mxu1 %v1075_v27 }
  0x81   :  { %1225 = vmatprep.subr.mxu1 %v987_v3 }
  0xf8   :  { %v2451_v55 = vpop.f32.mrf.mxu1 }
  0xfa   :  { %v2416_v53 = vpop.f32.mrf.mxu0  ;;  %v2452_v41 = vpop.f32.mrf.mxu1 }
  0xfb   :  { %v2453_v54 = vadd.f32 %v2452_v41, %v2451_v55  ;;  %v1463_v55 = vld [vmem:[%s4213_s3 + $0x68] sm:$0xff]  ;;  %v3641_v41 = vsub.f32 %v1464_v0, %v3623_v7  ;;  %v3753_v0 = vand.u32 4294901760, %v1459_v25 }
  0xfc   :  { %v2417_v52 = vpop.f32.mrf.mxu0 }
  0xfd   :  { %v2418_v49 = vadd.f32 %v2417_v52, %v2416_v53  ;;  %v3633_v53 = vand.u32 4294901760, %v1479_v23  ;;  %v4311_v52 = vand.u32 4294901760, %v3621_v58 }
  0xff   :  { %v419_v15 = vadd.f32 %v2453_v54, %v2418_v49  ;;  %v4309_v54 = vand.u32 4294901760, %v3631_v36 }
 0x11a   :  { %v2486_v37 = vpop.f32.mrf.mxu0 }
 0x11b   :  { %v2521_v40 = vpop.f32.mrf.mxu1 }
 0x11c   :  { %v2487_v39 = vpop.f32.mrf.mxu0 }
 0x11d   :  { %v2522_v14 = vpop.f32.mrf.mxu1  ;;  %v2488_v9 = vadd.f32 %v2487_v39, %v2486_v37  ;;  %v3643_v37 = vand.u32 4294901760, %v1463_v55  ;;  %v1734_v39 = vsub.f32 %v3612_v63, %v4312_v32 }
 0x11e   :  { %v2523_v57 = vadd.f32 %v2522_v14, %v2521_v40  ;;  %v1478_v40 = vld [vmem:[%s4213_s3 + $0xe0] sm:$0xff]  ;;  %v3654_v14 = vsub.f32 %v1479_v23, %v3633_v53 }
 0x11f   :  { %v557_v8 = vadd.f32 %v2488_v9, %v419_v15  ;;  %v3656_v49 = vand.u32 4294901760, %v1478_v40  ;;  %v1462_v9 = vld [vmem:[%s4213_s3 + $0x60] sm:$0xff]  ;;  %v4308_v15 = vand.u32 4294901760, %v3641_v41 }
 0x121   :  { %v665_v13 = vadd.f32 %v2523_v57, %v557_v8  ;;  %v3667_v57 = vsub.f32 %v1463_v55, %v3643_v37  ;;  %v1477_v8 = vld [vmem:[%s4213_s3 + $0xd8] sm:$0xff] }
 0x122   :  { %v3701_v34 = vand.u32 4294901760, %v1477_v8 }
 0x124   :  { %v3719_v19 = vsub.f32 %v1477_v8, %v3701_v34  ;;  %v3771_v8 = vsub.f32 %v1459_v25, %v3753_v0 }
 0x13a   :  { %v2556_v22 = vpop.f32.mrf.mxu0 }
 0x13c   :  { %v2557_v31 = vpop.f32.mrf.mxu0 }
 0x13d   :  { %v2558_v44 = vadd.f32 %v2557_v31, %v2556_v22  ;;  %v1622_v22 = vsub.f32 %v3621_v58, %v4311_v52  ;;  %v3669_v31 = vand.u32 4294901760, %v1462_v9 }
 0x13e   :  { %v2591_v45 = vpop.f32.mrf.mxu1 }
 0x13f   :  { %v833_v46 = vadd.f32 %v2558_v44, %v665_v13  ;;  %v1735_v44 = vand.u32 4294901760, %v1734_v39  ;;  %v4306_v13 = vand.u32 4294901760, %v3654_v14 }
 0x140   :  { %v2592_v42 = vpop.f32.mrf.mxu1 }
 0x141   :  { %v2593_v30 = vadd.f32 %v2592_v42, %v2591_v45  ;;  %v1741_v45 = vsub.f32 %v3631_v36, %v4309_v54  ;;  %v3680_v42 = vsub.f32 %v1478_v40, %v3656_v49 }
 0x143   :  { %v937_v47 = vadd.f32 %v2593_v30, %v833_v46  ;;  %v1461_v46 = vld [vmem:[%s4213_s3 + $0x58] sm:$0xff]  ;;  %v1623_v30 = vand.u32 4294901760, %v1622_v22 }
 0x144   :  { %v3710_v10 = vand.u32 4294901760, %v1461_v46 }
 0x145   :  { %v941_v17 = vsel %vm940_vm0, %v937_v47, -inf }
 0x146   :  { %942 = vmax.xlane.f32.xlu0 %v941_v17  ;;  %v4305_v17 = vand.u32 4294901760, %v3667_v57 }
 0x1cf   :  { %v943_v29 = vpop.xlane.xlu0 %942 }
 0x1d0   :  { %v944_v2 = vsub.f32 %v937_v47, %v943_v29  ;;  %v1629_v47 = vsub.f32 %v3641_v41, %v4308_v15  ;;  %v3691_v29 = vsub.f32 %v1462_v9, %v3669_v31 }
 0x1d2   :  { %v945_v21 = vmul.f32 1.442695, %v944_v2  ;;  %v1476_v2 = vld [vmem:[%s4213_s3 + $0xd0] sm:$0xff] }
 0x1d3   :  { %v3721_v20 = vand.u32 4294901760, %v1476_v2 }
 0x1d4   :  { %2809 = vpow2.f32 %v945_v21  ;;  %v1742_v21 = vand.u32 4294901760, %v1741_v45  ;;  %v1473_v45 = vld [vmem:[%s4213_s3 + $0xb8] sm:$0xff] }
 0x1e1   :  { %v2810_v26 = vpop.eup %2809 }
 0x1e2   :  { %v947_v28 = vsel %vm940_vm0, %v2810_v26, 0.0 }
 0x1e3   :  { %948 = vadd.xlane.f32.xlu0 %v947_v28  ;;  %v4304_v28 = vand.u32 4294901760, %v3680_v42 }
 0x26c   :  { %v949_v33 = vpop.xlane.xlu0 %948 }
 0x26d   :  { %2811 = vrcp.f32 %v949_v33 }
 0x27a   :  { %v2812_v43 = vpop.eup %2811 }
 0x27b   :  { %v951_v35 = vmul.f32 %v2812_v43, %v2810_v26  ;;  %v1748_v26 = vsub.f32 %v3654_v14, %v4306_v13  ;;  %v3731_v43 = vsub.f32 %v1461_v46, %v3710_v10 }
 0x27d   :  { %v955_v48 = vsel %vm940_vm0, %v951_v35, 0  ;;  %v3733_v35 = vand.u32 4294901760, %v1460_v38  ;;  %v4299_v1 = vand.u32 4294901760, %v3731_v43 }
 0x27e   :  { %v1024_v62 = vand.u32 4294901760, %v955_v48 }
 0x27f   :  { %v3751_v60 = vsub.f32 %v1460_v38, %v3733_v35  ;;  %v1650_v9 = vsub.f32 %v3731_v43, %v4299_v1 }
 0x280   :  { %v1025_v6 = vsub.f32 %v955_v48, %v1024_v62  ;;  %1111 = vmatmul.mubr.f32.vlgmr.msra.gmra.mxu1 %v1024_v62  ;;  %v1474_v48 = vld [vmem:[%s4213_s3 + $0xc0] sm:$0xff] }
 0x281   :  { %1227 = vmatpush1.msra.mxu1 %v989_v4  ;;  %1260 = vmatprep.mubr.f32.mxu1 %v2840_v5  ;;  %v3763_v39 = vand.u32 4294901760, %v1474_v48  ;;  %v4296_v22 = vand.u32 4294901760, %v3751_v60 }
 0x282   :  { %v1026_v16 = vand.u32 4294901760, %v1025_v6  ;;  %1379 = vmatprep.subr.mxu1 %v987_v3  ;;  %v1630_v3 = vand.u32 4294901760, %v1629_v47 }
 0x283   :  { %v1657_v38 = vsub.f32 %v3751_v60, %v4296_v22 }
 0x284   :  { %1264 = vmatmul.mubr.f32.vlgmr.msra.gmra.mxu1 %v1026_v16  ;;  %v1027_v50 = vsub.f32 %v1025_v6, %v1026_v16  ;;  %v3741_v16 = vsub.f32 %v1476_v2, %v3721_v20  ;;  %v3784_v2 = vsub.f32 %v1474_v48, %v3763_v39 }
 0x285   :  { %1381 = vmatpush1.msra.mxu1 %v989_v4  ;;  %1414 = vmatprep.mubr.f32.mxu1 %v2840_v5  ;;  %v1636_v4 = vsub.f32 %v3667_v57, %v4305_v17  ;;  %v1658_v48 = vand.u32 4294901760, %v1657_v38  ;;  %v1455_v38 = vld [vmem:[%s4213_s3 + $0x28] sm:$0xff] }
 0x286   :  { %v1028_v56 = vand.u32 4294901760, %v1027_v50  ;;  %2629 = vmatprep.subr.mxu1 %v1735_v44  ;;  %v4298_v55 = vand.u32 4294901760, %v3741_v16  ;;  %v4294_v25 = vand.u32 4294901760, %v3784_v2 }
 0x287   :  { %v1637_v27 = vand.u32 4294901760, %v1636_v4 }
 0x288   :  { %1029 = vmatmul.mubr.f32.vlgmr.msra.gmra.mxu0 %v1028_v56  ;;  %1416 = vmatmul.mubr.f32.vlgmr.msra.gmra.mxu1 %v1024_v62  ;;  %v1458_v56 = vld [vmem:[%s4213_s3 + $0x40] sm:$0xff] }
 0x289   :  { %1152 = vmatpush1.msra.mxu0 %v1072_v11  ;;  %1185 = vmatprep.mubr.f32.mxu0 %v2840_v5  ;;  %v1475_v11 = vld [vmem:[%s4213_s3 + $0xc8] sm:$0xff]  ;;  %v3773_v44 = vand.u32 4294901760, %v1458_v56 }
 0x28a   :  { %1303 = vmatprep.subr.mxu0 %v1067_v12  ;;  %2630 = vmatpush3.msra.mxu1 %v1623_v30  ;;  %v1749_v12 = vand.u32 4294901760, %v1748_v26  ;;  %v3743_v50 = vand.u32 4294901760, %v1475_v11  ;;  %v1769_v30 = vsub.f32 %v3741_v16, %v4298_v55  ;;  %v1651_v26 = vand.u32 4294901760, %v1650_v9 }
 0x28b   :  { %2631 = vmatprep.subr.mxu1 %v1742_v21  ;;  %v1457_v21 = vld [vmem:[%s4213_s3 + $0x38] sm:$0xff]  ;;  %v3795_v4 = vsub.f32 %v1458_v56, %v3773_v44 }
 0x28c   :  { %1188 = vmatmul.mubr.f32.vlgmr.msra.gmra.mxu0 %v1025_v6  ;;  %2632 = vmatpush3.msra.mxu1 %v1630_v3  ;;  %v4300_v6 = vand.u32 4294901760, %v3719_v19  ;;  %v3761_v40 = vsub.f32 %v1475_v11, %v3743_v50  ;;  %v4293_v3 = vand.u32 4294901760, %v3771_v8  ;;  %v1472_v11 = vld [vmem:[%s4213_s3 + $0xb0] sm:$0xff] }
 0x28d   :  { %1307 = vmatpush1.msra.mxu0 %v1073_v18  ;;  %1340 = vmatprep.mubr.f32.mxu0 %v2840_v5  ;;  %v4302_v5 = vand.u32 4294901760, %v3691_v29  ;;  %v1755_v18 = vsub.f32 %v3680_v42, %v4304_v28  ;;  %v4297_v56 = vand.u32 4294901760, %v3795_v4 }
 0x28e   :  { %2594 = vmatprep.subr.mxu0 %v3601_v24  ;;  %2633 = vmatprep.subr.mxu1 %v1749_v12  ;;  %v1762_v23 = vsub.f32 %v3719_v19, %v4300_v6  ;;  %v4295_v47 = vand.u32 4294901760, %v3761_v40  ;;  %v1770_v12 = vand.u32 4294901760, %v1769_v30 }
 0x28f   :  { %v1643_v33 = vsub.f32 %v3691_v29, %v4302_v5  ;;  %2634 = vmatpush3.msra.mxu1 %v1637_v27  ;;  %v3805_v27 = vand.u32 4294901760, %v1473_v45 }
 0x290   :  { %1342 = vmatmul.mubr.f32.vlgmr.msra.gmra.mxu0 %v1024_v62  ;;  %v1756_v62 = vand.u32 4294901760, %v1755_v18  ;;  %v1763_v46 = vand.u32 4294901760, %v1762_v23  ;;  %v1776_v18 = vsub.f32 %v3761_v40, %v4295_v47  ;;  %v1471_v23 = vld [vmem:[%s4213_s3 + $0xa8] sm:$0xff] }
 0x291   :  { %2595 = vmatpush3.msra.mxu0 %v3606_v51  ;;  %v1644_v61 = vand.u32 4294901760, %v1643_v33  ;;  %v1456_v33 = vld [vmem:[%s4213_s3 + $0x30] sm:$0xff]  ;;  %v3823_v30 = vsub.f32 %v1473_v45, %v3805_v27  ;;  %v1470_v45 = vld [vmem:[%s4213_s3 + $0xa0] sm:$0xff]  ;;  %v3847_v22 = vand.u32 4294901760, %v1471_v23 }
 0x292   :  { %2596 = vmatprep.subr.mxu0 %v3614_v59  ;;  %2635 = vmatprep.subr.mxu1 %v1756_v62  ;;  %v1664_v62 = vsub.f32 %v3771_v8, %v4293_v3  ;;  %v1777_v9 = vand.u32 4294901760, %v1776_v18 }
 0x293   :  { %2597 = vmatpush3.msra.mxu0 %v3623_v7  ;;  %2636 = vmatpush3.msra.mxu1 %v1644_v61  ;;  %v3814_v61 = vand.u32 4294901760, %v1457_v21  ;;  %v3865_v6 = vsub.f32 %v1471_v23, %v3847_v22  ;;  %v1469_v23 = vld [vmem:[%s4213_s3 + $0x98] sm:$0xff] }
 0x294   :  { %2598 = vmatprep.subr.mxu0 %v3633_v53  ;;  %2637 = vmatprep.subr.mxu1 %v1763_v46  ;;  %v1783_v46 = vsub.f32 %v3784_v2, %v4294_v25  ;;  %v1665_v3 = vand.u32 4294901760, %v1664_v62  ;;  %v3837_v25 = vand.u32 4294901760, %v1456_v33 }
 0x295   :  { %2599 = vmatpush3.msra.mxu0 %v3643_v37  ;;  %2638 = vmatpush3.msra.mxu1 %v1651_v26  ;;  %v3825_v26 = vand.u32 4294901760, %v1472_v11  ;;  %v3835_v18 = vsub.f32 %v1457_v21, %v3814_v61  ;;  %v1454_v21 = vld [vmem:[%s4213_s3 + $0x20] sm:$0xff]  ;;  %4474 = vst [vmem:[#allocation7_spill] sm:$0xff] %v3865_v6 }
 0x296   :  { %2600 = vmatprep.subr.mxu0 %v3656_v49  ;;  %2639 = vmatprep.subr.mxu1 %v1770_v12  ;;  %v1671_v12 = vsub.f32 %v3795_v4, %v4297_v56  ;;  %v1784_v47 = vand.u32 4294901760, %v1783_v46  ;;  %v3857_v46 = vand.u32 4294901760, %v1455_v38 }
 0x297   :  { %2601 = vmatpush3.msra.mxu0 %v3669_v31  ;;  %2640 = vmatpush3.msra.mxu1 %v1658_v48  ;;  %4471 = vst [vmem:[#allocation16_spill] sm:$0xff] %v3835_v18  ;;  %v4301_v48 = vand.u32 4294901760, %v3823_v30  ;;  %v3845_v62 = vsub.f32 %v1472_v11, %v3825_v26  ;;  %v4303_v55 = vand.u32 4294901760, %v3835_v18 }
 0x298   :  { %2602 = vmatprep.subr.mxu0 %v3701_v34  ;;  %2641 = vmatprep.subr.mxu1 %v1777_v9  ;;  %v1672_v56 = vand.u32 4294901760, %v1671_v12  ;;  %v3855_v9 = vsub.f32 %v1456_v33, %v3837_v25  ;;  %v3875_v12 = vsub.f32 %v1455_v38, %v3857_v46  ;;  %v1453_v38 = vld [vmem:[%s4213_s3 + $0x18] sm:$0xff] }
 0x299   :  { %2603 = vmatpush3.msra.mxu0 %v3710_v10  ;;  %4472 = vst [vmem:[#allocation6_spill] sm:$0xff] %v3845_v62  ;;  %2642 = vmatpush3.msra.mxu1 %v1665_v3  ;;  %v1790_v11 = vsub.f32 %v3823_v30, %v4301_v48  ;;  %v4307_v1 = vand.u32 4294901760, %v3845_v62  ;;  %v3867_v3 = vand.u32 4294901760, %v1470_v45  ;;  %v1678_v33 = vsub.f32 %v3835_v18, %v4303_v55 }
 0x29a   :  { %2604 = vmatprep.subr.mxu0 %v3721_v20  ;;  %4473 = vst [vmem:[#allocation18_spill] sm:$0xff] %v3855_v9  ;;  %2643 = vmatprep.subr.mxu1 %v1784_v47  ;;  %v4310_v47 = vand.u32 4294901760, %v3855_v9  ;;  %4475 = vst [vmem:[#allocation19_spill] sm:$0xff] %v3875_v12  ;;  %v3877_v48 = vand.u32 4294901760, %v1454_v21  ;;  %v4313_v55 = vand.u32 4294901760, %v3865_v6  ;;  %v4318_v13 = vand.u32 4294901760, %v3875_v12 }
 0x29b   :  { %2605 = vmatpush3.msra.mxu0 %v3733_v35  ;;  %2644 = vmatpush3.msra.mxu1 %v1672_v56  ;;  %v1791_v5 = vand.u32 4294901760, %v1790_v11  ;;  %v1797_v56 = vsub.f32 %v3845_v62, %v4307_v1  ;;  %v3888_v28 = vsub.f32 %v1470_v45, %v3867_v3  ;;  %v1679_v17 = vand.u32 4294901760, %v1678_v33  ;;  %v1468_v45 = vld [vmem:[%s4213_s3 + $0x90] sm:$0xff] }
 0x29c   :  { %2606 = vmatprep.subr.mxu0 %v3743_v50  ;;  %v1685_v11 = vsub.f32 %v3855_v9, %v4310_v47  ;;  %v3899_v1 = vsub.f32 %v1454_v21, %v3877_v48  ;;  %v1804_v33 = vsub.f32 %v3865_v6, %v4313_v55  ;;  %v3909_v47 = vand.u32 4294901760, %v1469_v23  ;;  %v1452_v21 = vld [vmem:[%s4213_s3 + $0x10] sm:$0xff]  ;;  %v1467_v55 = vld [vmem:[%s4213_s3 + $0x88] sm:$0xff] }
 0x29d   :  { %2607 = vmatpush3.msra.mxu0 %v3753_v0  ;;  %4476 = vst [vmem:[#allocation21_spill] sm:$0xff] %v3888_v28  ;;  %2645 = vmatprep.subr.mxu1 %v1791_v5  ;;  %v1798_v15 = vand.u32 4294901760, %v1797_v56  ;;  %v1692_v32 = vsub.f32 %v3875_v12, %v4318_v13  ;;  %v3918_v56 = vand.u32 4294901760, %v1453_v38  ;;  %v4480_v6 = vand.u32 4294901760, %v3888_v28  ;;  %v1451_v13 = vld [vmem:[%s4213_s3 + $0x8] sm:$0xff] }
 0x29e   :  { %2608 = vmatprep.subr.mxu0 %v3763_v39  ;;  %4477 = vst [vmem:[#allocation9_spill] sm:$0xff] %v3899_v1  ;;  %4478 = vst [vmem:[#allocation23_spill] sm:$0xff] %v3909_v47  ;;  %2646 = vmatpush3.msra.mxu1 %v1679_v17  ;;  %v1686_v52 = vand.u32 4294901760, %v1685_v11  ;;  %v1805_v54 = vand.u32 4294901760, %v1804_v33  ;;  %v3927_v17 = vsub.f32 %v1469_v23, %v3909_v47  ;;  %v3929_v11 = vand.u32 4294901760, %v1468_v45  ;;  %v1466_v23 = vld [vmem:[%s4213_s3 + $0x80] sm:$0xff] }
 0x29f   :  { %2609 = vmatpush3.msra.mxu0 %v3773_v44  ;;  %4479 = vst [vmem:[#allocation25_spill] sm:$0xff] %v3918_v56  ;;  %2647 = vmatprep.subr.mxu1 %v1798_v15  ;;  %v1811_v9 = vsub.f32 %v3888_v28, %v4480_v6  ;;  %v1693_v5 = vand.u32 4294901760, %v1692_v32  ;;  %v4483_v15 = vand.u32 4294901760, %v3899_v1  ;;  %v3939_v12 = vsub.f32 %v1453_v38, %v3918_v56  ;;  %v1450_v38 = vld [vmem:[%s4213_s3] sm:$0xff] }
 0x2a0   :  { %2610 = vmatprep.subr.mxu0 %v3805_v27  ;;  %4481 = vst [vmem:[#allocation11_spill] sm:$0xff] %v3927_v17  ;;  %4482 = vst [vmem:[#allocation27_spill] sm:$0xff] %v3929_v11  ;;  %2648 = vmatpush3.msra.mxu1 %v1686_v52  ;;  %v3941_v6 = vand.u32 4294901760, %v1452_v21  ;;  %v4331_v52 = vand.u32 4294901760, %v3927_v17  ;;  %v3949_v32 = vsub.f32 %v1468_v45, %v3929_v11  ;;  %v3951_v62 = vand.u32 4294901760, %v1467_v55 }
 0x2a1   :  { %2611 = vmatpush3.msra.mxu0 %v3814_v61  ;;  %v1699_v33 = vsub.f32 %v3899_v1, %v4483_v15  ;;  %4484 = vst [vmem:[#allocation12_spill] sm:$0xff] %v3939_v12  ;;  %2649 = vmatprep.subr.mxu1 %v1805_v54  ;;  %v1812_v28 = vand.u32 4294901760, %v1811_v9  ;;  %v4336_v1 = vand.u32 4294901760, %v3939_v12  ;;  %v3961_v9 = vand.u32 4294901760, %v1451_v13 }
 0x2a2   :  { %2612 = vmatprep.subr.mxu0 %v3825_v26  ;;  %4485 = vst [vmem:[#allocation13_spill] sm:$0xff] %v3941_v6  ;;  %4486 = vst [vmem:[#allocation15_spill] sm:$0xff] %v3949_v32  ;;  %2650 = vmatpush3.msra.mxu1 %v1693_v5  ;;  %v3959_v54 = vsub.f32 %v1452_v21, %v3941_v6  ;;  %v1818_v45 = vsub.f32 %v3927_v17, %v4331_v52  ;;  %v3971_v5 = vand.u32 4294901760, %v1466_v23 }
 0x2a3   :  { %2613 = vmatpush3.msra.mxu0 %v3837_v25  ;;  %4487 = vst [vmem:[#allocation17_spill] sm:$0xff] %v3951_v62  ;;  %v1700_v15 = vand.u32 4294901760, %v1699_v33  ;;  %4489 = vst [vmem:[#allocation10_spill] sm:$0xff] %v3961_v9  ;;  %2651 = vmatprep.subr.mxu1 %v1812_v28  ;;  %v1706_v21 = vsub.f32 %v3939_v12, %v4336_v1  ;;  %v3979_v33 = vsub.f32 %v1451_v13, %v3961_v9 }
 0x2a4   :  { %2614 = vmatprep.subr.mxu0 %v3847_v22  ;;  %4488 = vst [vmem:[#allocation8_spill] sm:$0xff] %v3959_v54  ;;  %4491 = vst [vmem:[#allocation20_spill] sm:$0xff] %v3971_v5  ;;  %v4342_v28 = vand.u32 4294901760, %v3959_v54  ;;  %v3981_v52 = vand.u32 4294901760, %v1450_v38 }
 0x2a5   :  { %2615 = vmatpush3.msra.mxu0 %v3857_v46  ;;  %2652 = vmatpush3.msra.mxu1 %v1700_v15  ;;  %4492 = vst [vmem:[#allocation22_spill] sm:$0xff] %v3979_v33  ;;  %v1707_v1 = vand.u32 4294901760, %v1706_v21  ;;  %v4346_v12 = vand.u32 4294901760, %v3979_v33 }
 0x2a6   :  { %2616 = vmatprep.subr.mxu0 %v3867_v3  ;;  %4493 = vst [vmem:[#allocation32_spill] sm:$0xff] %v3981_v52  ;;  %v1713_v13 = vsub.f32 %v3959_v54, %v4342_v28 }
 0x2a7   :  { %2617 = vmatpush3.msra.mxu0 %v3877_v48  ;;  %v1720_v28 = vsub.f32 %v3979_v33, %v4346_v12 }
 0x2a8   :  { %2618 = vmatprep.subr.mxu0 %v3909_v47  ;;  %v1714_v21 = vand.u32 4294901760, %v1713_v13  ;;  %v4496_v47 = vld [vmem:[#allocation30_spill] sm:$0xff] }
 0x2a9   :  { %2619 = vmatpush3.msra.mxu0 %v3918_v56  ;;  %v4339_v56 = vand.u32 4294901760, %v3949_v32 }
 0x2aa   :  { %2620 = vmatprep.subr.mxu0 %v3929_v11  ;;  %v3969_v11 = vsub.f32 %v1467_v55, %v3951_v62  ;;  %v1819_v55 = vand.u32 4294901760, %v1818_v45  ;;  %v3997_v45 = vsub.f32 %v1450_v38, %v3981_v52 }
 0x2ab   :  { %2621 = vmatpush3.msra.mxu0 %v3941_v6  ;;  %v1825_v17 = vsub.f32 %v3949_v32, %v4339_v56 }
 0x2ac   :  { %4490 = vst [vmem:[#allocation31_spill] sm:$0xff] %v3969_v11  ;;  %2622 = vmatprep.subr.mxu0 %v3951_v62  ;;  %v4345_v15 = vand.u32 4294901760, %v3969_v11  ;;  %v3989_v62 = vsub.f32 %v1466_v23, %v3971_v5  ;;  %4495 = vst [vmem:[#allocation26_spill] sm:$0xff] %v3997_v45  ;;  %2653 = vmatprep.subr.mxu1 %v1819_v55  ;;  %v4357_v38 = vand.u32 4294901760, %v3997_v45  ;;  %v1721_v55 = vand.u32 4294901760, %v1720_v28 }
 0x2ad   :  { %2623 = vmatpush3.msra.mxu0 %v3961_v9  ;;  %v1826_v56 = vand.u32 4294901760, %v1825_v17  ;;  %2654 = vmatpush3.msra.mxu1 %v1707_v1 }
 0x2ae   :  { %4494 = vst [vmem:[#allocation24_spill] sm:$0xff] %v3989_v62  ;;  %2624 = vmatprep.subr.mxu0 %v3971_v5  ;;  %v1832_v23 = vsub.f32 %v3969_v11, %v4345_v15  ;;  %v4350_v32 = vand.u32 4294901760, %v3989_v62  ;;  %v1727_v15 = vsub.f32 %v3997_v45, %v4357_v38 }
 0x2af   :  { %2625 = vmatpush3.msra.mxu0 %v3981_v52  ;;  %2655 = vmatprep.subr.mxu1 %v1826_v56 }
 0x2b0   :  { %2664 = vmatprep.subr.mxu0 %v3612_v63  ;;  %v1833_v54 = vand.u32 4294901760, %v1832_v23  ;;  %v1839_v17 = vsub.f32 %v3989_v62, %v4350_v32  ;;  %2656 = vmatpush3.msra.mxu1 %v1714_v21  ;;  %v1728_v13 = vand.u32 4294901760, %v1727_v15 }
 0x2b2   :  { %2657 = vmatprep.subr.mxu1 %v1833_v54  ;;  %v1840_v1 = vand.u32 4294901760, %v1839_v17 }
 0x2b3   :  { %2658 = vmatpush3.msra.mxu1 %v1721_v55 }
 0x2b4   :  { %2659 = vmatprep.subr.mxu1 %v1840_v1 }
 0x2b5   :  { %2660 = vmatpush3.msra.mxu1 %v1728_v13 }
 0x2b6   :  { %2699 = vmatprep.subr.mxu1 %v3601_v24 }
 0x340   :  { %v1112_v56 = vpop.f32.mrf.mxu1 }
 0x342   :  { %v1114_v23 = vpop.f32.mrf.mxu1 }
 0x344   :  { %v1265_v12 = vpop.f32.mrf.mxu1 }
 0x346   :  { %v1267_v21 = vpop.f32.mrf.mxu1 }
 0x348   :  { %v1030_v63 = vpop.f32.mrf.mxu0  ;;  %v1417_v17 = vpop.f32.mrf.mxu1 }
 0x349   :  { %v1113_v32 = vadd.f32 %v1112_v56, %v1030_v63 }
 0x34a   :  { %v1032_v33 = vpop.f32.mrf.mxu0  ;;  %v1419_v24 = vpop.f32.mrf.mxu1 }
 0x34b   :  { %v1115_v62 = vadd.f32 %v1114_v23, %v1032_v33 }
 0x34c   :  { %v1189_v28 = vpop.f32.mrf.mxu0 }
 0x34d   :  { %v1190_v11 = vadd.f32 %v1189_v28, %v1113_v32 }
 0x34e   :  { %v1191_v52 = vpop.f32.mrf.mxu0 }
 0x34f   :  { %v1192_v38 = vadd.f32 %v1191_v52, %v1115_v62  ;;  %v1266_v54 = vadd.f32 %v1265_v12, %v1190_v11  ;;  %v2813_v62 = vld [vmem:[%s4210_s0] sm:$0xf]  ;;  %v2814_v11 = vld [vmem:[%s4210_s0 + $0x4] sm:$0xf] }
 0x350   :  { %v1343_v55 = vpop.f32.mrf.mxu0 }
 0x351   :  { %v1344_v15 = vadd.f32 %v1343_v55, %v1266_v54  ;;  %v1268_v1 = vadd.f32 %v1267_v21, %v1192_v38 }
 0x352   :  { %v1345_v13 = vpop.f32.mrf.mxu0 }
 0x353   :  { %v1346_v45 = vadd.f32 %v1345_v13, %v1268_v1  ;;  %v1418_v5 = vadd.f32 %v1417_v17, %v1344_v15 }
 0x355   :  { %v1420_v9 = vadd.f32 %v1419_v24, %v1346_v45  ;;  %v2815_v24 = vld [vmem:[%s4210_s0 + $0x8] sm:$0xf] }
 0x357   :  { %v1424_v6 = vcombine.low %v1418_v5, %v1420_v9  ;;  %v1425_v18 = vcombine.high %v1418_v5, %v1420_v9 }
 0x359   :  { %v1432_v63 = vrot.slane %v1424_v6, %v4496_v47  ;;  %v1439_v56 = vrot.slane %v1425_v18, %v4496_v47  ;;  %v2816_v18 = vld [vmem:[%s4210_s0 + $0xc] sm:$0xf]  ;;  %s2841_s0 = smov [#allocation2]  }
 0x35a   :  { %s2376_s26 = sshll.u32 %s2841_s0, 4  ;;  %s2377_s26 = int_to_ptr.vmem [resolvable:$true] %s2376_s26 }
 0x35b   :  { %v1440_v33 = vcombine.high %v1432_v63, %v1432_v63  ;;  %v1441_v32 = vcombine.high %v1439_v56, %v1439_v56  ;;  %v1446_v12 = vmul.f32 %v2813_v62, %v1432_v63  ;;  %v1448_v9 = vmul.f32 %v2815_v24, %v1439_v56  ;;  %v4498_v62 = vld [vmem:[#allocation16_spill] sm:$0xff]  ;;  %v4502_v24 = vld [vmem:[#allocation18_spill] sm:$0xff]  ;;  %s2817_s27 = scalar_lea.vmem %s2377_s26, 128  ;;  %p2822_p1 = scmp.lt.s32.totalorder %s2377_s26, %s2377_s26 }
 0x35c   :  { %p2818_p0 = scmp.ne.s32.totalorder %s2377_s26, %s2817_s27  ;;  %p2823_p2 = scmp.lt.s32.totalorder %s2817_s27, %s2817_s27 }
 0x35d   :  { %v1447_v52 = vmul.f32 %v2814_v11, %v1440_v33  ;;  %v1449_v6 = vmul.f32 %v2816_v18, %v1441_v32  ;;  %v4497_v32 = vld [vmem:[#allocation23_spill] sm:$0xff]  ;;  %v4500_v11 = vld [vmem:[#allocation6_spill] sm:$0xff] }
 0x35e   :  { %v4504_v18 = vld [vmem:[#allocation7_spill] sm:$0xff]  ;;  %p2824_p3 = por %p2823_p2, %p2822_p1 }
 0x35f   :  { %v1486_v5 = vcombine.low %v1446_v12, %v1447_v52  ;;  %v1487_v45 = vcombine.low %v1448_v9, %v1449_v6  ;;  %v4499_v12 = vld [vmem:[#allocation25_spill] sm:$0xff]  ;;  %v4501_v52 = vld [vmem:[#allocation27_spill] sm:$0xff] }
 0x360   :  { %v4503_v9 = vld [vmem:[#allocation13_spill] sm:$0xff]  ;;  %p2825_p4 = pnand %p2824_p3, %p2818_p0 }
 0x361   :  { %v1494_v38 = vrot.slane %v1486_v5, %v4496_v47  ;;  %v1501_v23 = vrot.slane %v1487_v45, %v4496_v47  ;;  %v4505_v6 = vld [vmem:[#allocation17_spill] sm:$0xff]  ;;  %v4506_v5 = vld [vmem:[#allocation19_spill] sm:$0xff]  ;;  %v4507_v45 = vld [vmem:[#allocation10_spill] sm:$0xff] }
 0x363   :  { %v1503_v21 = vcombine.high %v1494_v38, %v1501_v23  ;;  %v1502_v28 = vcombine.low %v1494_v38, %v1501_v23  ;;  %v4508_v38 = vld [vmem:[#allocation21_spill] sm:$0xff]  ;;  %v4509_v23 = vld [vmem:[#allocation20_spill] sm:$0xff] }
 0x365   :  { %v4032_v54 = vand.u32 4294901760, %v1503_v21  ;;  %v4034_v17 = vand.u32 4294901760, %v1502_v28 }
 0x367   :  { %1843 = vmatprep.mubr.f32.mxu1 %v4032_v54  ;;  %v4038_v55 = vsub.f32 %v1502_v28, %v4034_v17  ;;  %v1603_v15 = vsub.f32 %v1503_v21, %v4032_v54  ;;  %v4510_v21 = vld [vmem:[#allocation9_spill] sm:$0xff]  ;;  %v4511_v28 = vld [vmem:[#allocation32_spill] sm:$0xff] }
 0x368   :  { %1845 = vmatmul.mubr.f32.vlgmr.msra.gmra.mxu1 %v4034_v17 }
 0x369   :  { %2700 = vmatpush3.msra.mxu1 %v3606_v51  ;;  %v1604_v1 = vand.u32 4294901760, %v1603_v15  ;;  %v1610_v47 = vand.u32 4294901760, %v4038_v55 }
 0x36a   :  { %2701 = vmatprep.subr.mxu1 %v3614_v59 }
 0x36b   :  { %2702 = vmatpush3.msra.mxu1 %v3623_v7  ;;  %2087 = vmatprep.mubr.f32.mxu1 %v1604_v1  ;;  %v1605_v13 = vsub.f32 %v1603_v15, %v1604_v1  ;;  %v1611_v63 = vsub.f32 %v4038_v55, %v1610_v47  ;;  %v4513_v1 = vld [vmem:[#allocation14_spill] sm:$0xff] }
 0x36c   :  { %2703 = vmatprep.subr.mxu1 %v3633_v53 }
 0x36d   :  { %2704 = vmatpush3.msra.mxu1 %v3643_v37  ;;  %v1606_v56 = vand.u32 4294901760, %v1605_v13  ;;  %v1612_v33 = vand.u32 4294901760, %v1611_v63  ;;  %v4514_v13 = vld [vmem:[#allocation12_spill] sm:$0xff]  ;;  %v4515_v63 = vld [vmem:[#allocation15_spill] sm:$0xff] }
 0x36e   :  { %2705 = vmatprep.subr.mxu1 %v3656_v49 }
 0x36f   :  { %2706 = vmatpush3.msra.mxu1 %v3669_v31  ;;  %1607 = vmatprep.mubr.f32.mxu0 %v1606_v56  ;;  %v4516_v56 = vld [vmem:[#allocation8_spill] sm:$0xff] }
 0x370   :  { %2707 = vmatprep.subr.mxu1 %v3701_v34  ;;  %1613 = vmatmul.mubr.f32.vlgmr.msra.gmra.mxu0 %v1612_v33  ;;  %v4517_v33 = vld [vmem:[#allocation31_spill] sm:$0xff] }
 0x371   :  { %2665 = vmatpush3.msra.mxu0 %v3621_v58  ;;  %2708 = vmatpush3.msra.mxu1 %v3710_v10 }
 0x372   :  { %2666 = vmatprep.subr.mxu0 %v3631_v36  ;;  %1980 = vmatprep.mubr.f32.mxu0 %v1603_v15  ;;  %v4512_v15 = vld [vmem:[#allocation11_spill] sm:$0xff] }
 0x373   :  { %2709 = vmatprep.subr.mxu1 %v3721_v20  ;;  %2667 = vmatpush3.msra.mxu0 %v3641_v41 }
 0x374   :  { %2710 = vmatpush3.msra.mxu1 %v3733_v35  ;;  %2668 = vmatprep.subr.mxu0 %v3654_v14 }
 0x375   :  { %2711 = vmatprep.subr.mxu1 %v3743_v50  ;;  %2669 = vmatpush3.msra.mxu0 %v3667_v57 }
 0x376   :  { %2712 = vmatpush3.msra.mxu1 %v3753_v0  ;;  %2670 = vmatprep.subr.mxu0 %v3680_v42 }
 0x377   :  { %2713 = vmatprep.subr.mxu1 %v3763_v39  ;;  %2671 = vmatpush3.msra.mxu0 %v3691_v29 }
 0x378   :  { %2714 = vmatpush3.msra.mxu1 %v3773_v44  ;;  %2672 = vmatprep.subr.mxu0 %v3719_v19 }
 0x379   :  { %2715 = vmatprep.subr.mxu1 %v3805_v27  ;;  %2673 = vmatpush3.msra.mxu0 %v3731_v43 }
 0x37a   :  { %2716 = vmatpush3.msra.mxu1 %v3814_v61  ;;  %2674 = vmatprep.subr.mxu0 %v3741_v16 }
 0x37b   :  { %2717 = vmatprep.subr.mxu1 %v3825_v26  ;;  %2675 = vmatpush3.msra.mxu0 %v3751_v60 }
 0x37c   :  { %2718 = vmatpush3.msra.mxu1 %v3837_v25  ;;  %2676 = vmatprep.subr.mxu0 %v3761_v40 }
 0x37d   :  { %2719 = vmatprep.subr.mxu1 %v3847_v22  ;;  %2677 = vmatpush3.msra.mxu0 %v3771_v8 }
 0x37e   :  { %2720 = vmatpush3.msra.mxu1 %v3857_v46  ;;  %2678 = vmatprep.subr.mxu0 %v3784_v2 }
 0x37f   :  { %2721 = vmatprep.subr.mxu1 %v3867_v3  ;;  %2679 = vmatpush3.msra.mxu0 %v3795_v4 }
 0x380   :  { %2722 = vmatpush3.msra.mxu1 %v3877_v48  ;;  %2680 = vmatprep.subr.mxu0 %v3823_v30 }
 0x381   :  { %2723 = vmatprep.subr.mxu1 %v4497_v32  ;;  %2681 = vmatpush3.msra.mxu0 %v4498_v62 }
 0x382   :  { %2724 = vmatpush3.msra.mxu1 %v4499_v12  ;;  %2682 = vmatprep.subr.mxu0 %v4500_v11 }
 0x383   :  { %2725 = vmatprep.subr.mxu1 %v4501_v52  ;;  %2683 = vmatpush3.msra.mxu0 %v4502_v24 }
 0x384   :  { %2726 = vmatpush3.msra.mxu1 %v4503_v9  ;;  %2684 = vmatprep.subr.mxu0 %v4504_v18 }
 0x385   :  { %2727 = vmatprep.subr.mxu1 %v4505_v6  ;;  %2685 = vmatpush3.msra.mxu0 %v4506_v5 }
 0x386   :  { %2728 = vmatpush3.msra.mxu1 %v4507_v45  ;;  %2686 = vmatprep.subr.mxu0 %v4508_v38 }
 0x387   :  { %2729 = vmatprep.subr.mxu1 %v4509_v23  ;;  %2687 = vmatpush3.msra.mxu0 %v4510_v21 }
 0x388   :  { %2730 = vmatpush3.msra.mxu1 %v4511_v28  ;;  %2688 = vmatprep.subr.mxu0 %v4512_v15 }
 0x389   :  { %2091 = vmatmul.mubr.f32.vlgmr.msra.gmra.mxu1 %v1610_v47  ;;  %2769 = vmatprep.subr.mxu1 %v4513_v1  ;;  %v4518_v47 = vld [vmem:[#allocation22_spill] sm:$0xff]  ;;  %v4519_v1 = vld [vmem:[#allocation24_spill] sm:$0xff] }
 0x38a   :  { %2689 = vmatpush3.msra.mxu0 %v4514_v13  ;;  %2770 = vmatpush3.msra.mxu1 %v3606_v51  ;;  %v4520_v51 = vld [vmem:[#allocation26_spill] sm:$0xff] }
 0x38b   :  { %2361 = vmatprep.mubr.f32.mxu1 %v4032_v54  ;;  %2690 = vmatprep.subr.mxu0 %v4515_v63 }
 0x38c   :  { %2771 = vmatprep.subr.mxu1 %v3614_v59  ;;  %2691 = vmatpush3.msra.mxu0 %v4516_v56  ;;  %v4521_v59 = vld [vmem:[#allocation5_spill] sm:$0xff] }
 0x38d   :  { %2772 = vmatpush3.msra.mxu1 %v3623_v7  ;;  %2692 = vmatprep.subr.mxu0 %v4517_v33  ;;  %v4522_v7 = vand.u32 4294901760, %v4521_v59 }
 0x38e   :  { %2773 = vmatprep.subr.mxu1 %v3633_v53  ;;  %2693 = vmatpush3.msra.mxu0 %v4518_v47  ;;  %v4523_v53 = vand.u32 4294901760, %v3621_v58  ;;  %v4527_v58 = vand.u32 4294901760, %v3667_v57  ;;  %v4531_v57 = vand.u32 4294901760, %v3731_v43  ;;  %v4538_v43 = vand.u32 4294901760, %v3823_v30 }
 0x38f   :  { %2774 = vmatpush3.msra.mxu1 %v3643_v37  ;;  %2694 = vmatprep.subr.mxu0 %v4519_v1  ;;  %v4524_v37 = vand.u32 4294901760, %v3631_v36  ;;  %v4528_v36 = vand.u32 4294901760, %v3680_v42  ;;  %v4532_v42 = vand.u32 4294901760, %v3741_v16  ;;  %v4540_v16 = vand.u32 4294901760, %v4500_v11 }
 0x390   :  { %2775 = vmatprep.subr.mxu1 %v3656_v49  ;;  %2695 = vmatpush3.msra.mxu0 %v4520_v51  ;;  %v4525_v49 = vand.u32 4294901760, %v3641_v41  ;;  %v4529_v41 = vand.u32 4294901760, %v3691_v29  ;;  %v4533_v29 = vand.u32 4294901760, %v3751_v60  ;;  %v4542_v60 = vand.u32 4294901760, %v4504_v18 }
 0x391   :  { %2776 = vmatpush3.msra.mxu1 %v3669_v31  ;;  %1983 = vmatmul.mubr.f32.vlgmr.msra.gmra.mxu0 %v4038_v55  ;;  %v4526_v31 = vand.u32 4294901760, %v3654_v14  ;;  %v4530_v14 = vand.u32 4294901760, %v3719_v19  ;;  %v4536_v19 = vand.u32 4294901760, %v3784_v2  ;;  %v4549_v2 = vand.u32 4294901760, %v4516_v56 }
 0x392   :  { %2734 = vmatprep.subr.mxu0 %v4522_v7  ;;  %2777 = vmatprep.subr.mxu1 %v3701_v34  ;;  %v4534_v34 = vand.u32 4294901760, %v3761_v40  ;;  %v4544_v40 = vand.u32 4294901760, %v4508_v38 }
 0x393   :  { %2735 = vmatpush3.msra.mxu0 %v4523_v53  ;;  %2257 = vmatprep.mubr.f32.mxu0 %v4032_v54 }
 0x394   :  { %2778 = vmatpush3.msra.mxu1 %v3710_v10  ;;  %2736 = vmatprep.subr.mxu0 %v4524_v37  ;;  %v4535_v10 = vand.u32 4294901760, %v3771_v8  ;;  %v4547_v8 = vand.u32 4294901760, %v4514_v13 }
 0x395   :  { %2779 = vmatprep.subr.mxu1 %v3721_v20  ;;  %2737 = vmatpush3.msra.mxu0 %v4525_v49  ;;  %v4537_v20 = vand.u32 4294901760, %v3795_v4  ;;  %v4550_v4 = vand.u32 4294901760, %v4517_v33 }
 0x396   :  { %2780 = vmatpush3.msra.mxu1 %v3733_v35  ;;  %2738 = vmatprep.subr.mxu0 %v4526_v31  ;;  %v4539_v35 = vand.u32 4294901760, %v4498_v62 }
 0x397   :  { %2781 = vmatprep.subr.mxu1 %v3743_v50  ;;  %2739 = vmatpush3.msra.mxu0 %v4527_v58  ;;  %v4541_v50 = vand.u32 4294901760, %v4502_v24 }
 0x398   :  { %2782 = vmatpush3.msra.mxu1 %v3753_v0  ;;  %2740 = vmatprep.subr.mxu0 %v4528_v36  ;;  %v4543_v0 = vand.u32 4294901760, %v4506_v5 }
 0x399   :  { %2783 = vmatprep.subr.mxu1 %v3763_v39  ;;  %2741 = vmatpush3.msra.mxu0 %v4529_v41  ;;  %v4545_v39 = vand.u32 4294901760, %v4510_v21 }
 0x39a   :  { %2784 = vmatpush3.msra.mxu1 %v3773_v44  ;;  %2742 = vmatprep.subr.mxu0 %v4530_v14  ;;  %v4548_v44 = vand.u32 4294901760, %v4515_v63 }
 0x39b   :  { %2785 = vmatprep.subr.mxu1 %v3805_v27  ;;  %2743 = vmatpush3.msra.mxu0 %v4531_v57  ;;  %v4552_v27 = vand.u32 4294901760, %v4519_v1 }
 0x39c   :  { %2786 = vmatpush3.msra.mxu1 %v3814_v61  ;;  %2744 = vmatprep.subr.mxu0 %v4532_v42  ;;  %v4553_v61 = vand.u32 4294901760, %v4520_v51 }
 0x39d   :  { %2787 = vmatprep.subr.mxu1 %v3825_v26  ;;  %2745 = vmatpush3.msra.mxu0 %v4533_v29 }
 0x39e   :  { %2788 = vmatpush3.msra.mxu1 %v3837_v25  ;;  %2746 = vmatprep.subr.mxu0 %v4534_v34  ;;  %v4551_v25 = vand.u32 4294901760, %v4518_v47 }
 0x39f   :  { %2789 = vmatprep.subr.mxu1 %v3847_v22  ;;  %2747 = vmatpush3.msra.mxu0 %v4535_v10  ;;  %v4546_v22 = vand.u32 4294901760, %v4512_v15 }
 0x3a0   :  { %2790 = vmatpush3.msra.mxu1 %v3857_v46  ;;  %2748 = vmatprep.subr.mxu0 %v4536_v19 }
 0x3a1   :  { %2791 = vmatprep.subr.mxu1 %v3867_v3  ;;  %2749 = vmatpush3.msra.mxu0 %v4537_v20 }
 0x3a2   :  { %2792 = vmatpush3.msra.mxu1 %v3877_v48  ;;  %2750 = vmatprep.subr.mxu0 %v4538_v43 }
 0x3a3   :  { %2793 = vmatprep.subr.mxu1 %v4497_v32  ;;  %2751 = vmatpush3.msra.mxu0 %v4539_v35 }
 0x3a4   :  { %2794 = vmatpush3.msra.mxu1 %v4499_v12  ;;  %2752 = vmatprep.subr.mxu0 %v4540_v16 }
 0x3a5   :  { %2795 = vmatprep.subr.mxu1 %v4501_v52  ;;  %2753 = vmatpush3.msra.mxu0 %v4541_v50 }
 0x3a6   :  { %2796 = vmatpush3.msra.mxu1 %v4503_v9  ;;  %2754 = vmatprep.subr.mxu0 %v4542_v60 }
 0x3a7   :  { %2797 = vmatprep.subr.mxu1 %v4505_v6  ;;  %2755 = vmatpush3.msra.mxu0 %v4543_v0 }
 0x3a8   :  { %2798 = vmatpush3.msra.mxu1 %v4507_v45  ;;  %2756 = vmatprep.subr.mxu0 %v4544_v40 }
 0x3a9   :  { %2799 = vmatprep.subr.mxu1 %v4509_v23  ;;  %2757 = vmatpush3.msra.mxu0 %v4545_v39 }
 0x3aa   :  { %2800 = vmatpush3.msra.mxu1 %v4511_v28  ;;  %2758 = vmatprep.subr.mxu0 %v4546_v22 }
 0x3ab   :  { %2363 = vmatmul.mubr.f32.vlgmr.msra.gmra.mxu1 %v4034_v17  ;;  %2759 = vmatpush3.msra.mxu0 %v4547_v8 }
 0x3ac   :  { %2760 = vmatprep.subr.mxu0 %v4548_v44 }
 0x3ad   :  { %2761 = vmatpush3.msra.mxu0 %v4549_v2 }
 0x3ae   :  { %2762 = vmatprep.subr.mxu0 %v4550_v4 }
 0x3af   :  { %2763 = vmatpush3.msra.mxu0 %v4551_v25 }
 0x3b0   :  { %2764 = vmatprep.subr.mxu0 %v4552_v27 }
 0x3b1   :  { %2765 = vmatpush3.msra.mxu0 %v4553_v61 }
 0x3b2   :  { %2259 = vmatmul.mubr.f32.vlgmr.msra.gmra.mxu0 %v4034_v17 }
 0x428   :  { %v2661_v26 = vpop.f32.mrf.mxu1 }
 0x42a   :  { %v2662_v3 = vpop.f32.mrf.mxu1 }
 0x42b   :  { %v2663_v62 = vadd.f32 %v2662_v3, %v2661_v26 }
 0x430   :  { %v2626_v30 = vpop.f32.mrf.mxu0 }
 0x432   :  { %v2627_v48 = vpop.f32.mrf.mxu0 }
 0x433   :  { %v2628_v32 = vadd.f32 %v2627_v48, %v2626_v30 }
 0x435   :  { %v1847_v52 = vadd.f32 %v2663_v62, %v2628_v32 }
 0x449   :  { %v2731_v54 = vpop.f32.mrf.mxu1 }
 0x44b   :  { %v2732_v11 = vpop.f32.mrf.mxu1 }
 0x44c   :  { %v2733_v6 = vadd.f32 %v2732_v11, %v2731_v54 }
 0x451   :  { %v2696_v46 = vpop.f32.mrf.mxu0 }
 0x453   :  { %v2697_v55 = vpop.f32.mrf.mxu0 }
 0x454   :  { %v2698_v12 = vadd.f32 %v2697_v55, %v2696_v46 }
 0x456   :  { %v1985_v9 = vadd.f32 %v2698_v12, %v1847_v52 }
 0x458   :  { %v2093_v38 = vadd.f32 %v2733_v6, %v1985_v9 }
 0x46b   :  { %v2801_v24 = vpop.f32.mrf.mxu1 }
 0x46d   :  { %v2802_v5 = vpop.f32.mrf.mxu1 }
 0x46e   :  { %v2803_v23 = vadd.f32 %v2802_v5, %v2801_v24 }
 0x472   :  { %v2766_v18 = vpop.f32.mrf.mxu0 }
 0x474   :  { %v2767_v45 = vpop.f32.mrf.mxu0 }
 0x475   :  { %v2768_v17 = vadd.f32 %v2767_v45, %v2766_v18 }
 0x477   :  { %v2261_v21 = vadd.f32 %v2768_v17, %v2093_v38 }
 0x479   :  { %v2365_v28 = vadd.f32 %v2803_v23, %v2261_v21 }
 0x47b   :  { %2369 = vst.msk [vmem:[#allocation2] sm:$0xff] %vm2368_vm1, %v2365_v28 }
 0x47c   :  { %2828 = shalt.err (!%p2825_p4)
}
 0x47d   :  { %2379 = dma.vmem_to_hbm [thread:$0]  %s2377_s26, 128, %s4214_s4, [#allocation3]  }
 0x47e   :  { %2837 = dma.done.wait [#allocation3], 128  }
 0x47f   :  { %2838 = vsyncadd [#allocation3], 4294967168 }
 0x480   :  { %2383 = vsyncpa [#allocation3], 1 }

</bundles_post_ra>
